<compile_context>
chip_gen: v7x
topology: tpu7x:2x2x1
jax: 0.10.0
libtpu: 0.0.40
codegen_flags: <defaults>
</compile_context>

<pallas_src>
import functools
import math

import jax
import jax.numpy as jnp
from jax.experimental import pallas as pl
from jax.experimental.pallas import tpu as pltpu

LN_EPS = 1e-5


def _patch_merge_kernel(x_ref, wa_ref, wb_ref, wsum_ref, bias_ref, o_ref):
    # x_ref:    (tb, 2, W2, 2C)  two consecutive image rows per super-row
    # wa_ref:   (2C, 2C)         gamma-folded weight rows for even image rows
    # wb_ref:   (2C, 2C)         gamma-folded weight rows for odd image rows
    # wsum_ref: (1, 2C)   f32    column sums of the folded weight (mean term)
    # bias_ref: (1, 2C)   f32    beta @ W^T
    # o_ref:    (tb*W2, 2C)
    tb, _, w2, c2 = x_ref.shape
    rows = tb * w2

    r0 = x_ref[:, 0, :, :].reshape(rows, c2)      # [x0 | x2]  (model dtype)
    r1 = x_ref[:, 1, :, :].reshape(rows, c2)      # [x1 | x3]

    # LayerNorm statistics over the (virtual) merged 4C vector, in f32.
    r0f = r0.astype(jnp.float32)
    r1f = r1.astype(jnp.float32)
    inv_n = 1.0 / (2 * c2)                        # 1 / (4*C)
    s = (jnp.sum(r0f, axis=-1, keepdims=True)
         + jnp.sum(r1f, axis=-1, keepdims=True))
    sq = (jnp.sum(r0f * r0f, axis=-1, keepdims=True)
          + jnp.sum(r1f * r1f, axis=-1, keepdims=True))
    mean = s * inv_n
    var = jnp.maximum(sq * inv_n - mean * mean, 0.0)
    inv_std = jax.lax.rsqrt(var + LN_EPS)

    # MXU on the raw model-dtype tiles; mean/inv_std/bias in the f32 epilogue.
    acc = jnp.dot(r0, wa_ref[...], preferred_element_type=jnp.float32)
    acc = acc + jnp.dot(r1, wb_ref[...], preferred_element_type=jnp.float32)
    out = (acc - mean * wsum_ref[...]) * inv_std + bias_ref[...]
    o_ref[...] = out.astype(o_ref.dtype)


def _pick_super_row_tile(bth2, w2, c2, c2out, x_itemsize, w_itemsize):
    """Super-rows per grid step (each super-row yields w2 output rows)."""
    # Resident weights (assume double-buffered) + small f32 vectors.
    w_bytes = 2 * (2 * c2 * c2out * w_itemsize) + 2 * (2 * c2out * 4)
    # Per output row: double-buffered input (4C) + output (2C) in model dtype,
    # plus ~8 f32-wide temporaries of width 2C (stats + f32 accumulator).
    per_row = 2 * (2 * c2 * x_itemsize) + 2 * (c2out * x_itemsize) + 8 * c2 * 4
    budget = max((24 << 20) - w_bytes, 4 << 20)
    rows_cap = max(8, min(2048, budget // per_row))
    tb = max(1, rows_cap // w2)
    if tb >= bth2:
        return bth2                         # single full-extent block — always legal
    m = 8 // math.gcd(w2, 8)                # keep tb*w2 a multiple of 8
    tb = max(m, (tb // m) * m)
    return min(tb, bth2)


def _ln_reduce_pallas(xr, wa, wb, wsum, bias, *, tb, out_dtype):
    bth2, _, w2, c2 = xr.shape
    c2out = wa.shape[1]
    n = bth2 * w2
    grid = pl.cdiv(bth2, tb)

    x_bytes = tb * w2 * 2 * c2 * xr.dtype.itemsize
    o_bytes = tb * w2 * c2out * jnp.dtype(out_dtype).itemsize
    w_bytes = 2 * c2 * c2out * wa.dtype.itemsize + 2 * c2out * 4
    tmp_bytes = 8 * tb * w2 * c2 * 4
    vmem_limit = int(min(48 << 20,
                         max(32 << 20,
                             2 * (x_bytes + o_bytes + w_bytes) + tmp_bytes)))

    return pl.pallas_call(
        _patch_merge_kernel,
        out_shape=jax.ShapeDtypeStruct((n, c2out), out_dtype),
        grid_spec=pltpu.PrefetchScalarGridSpec(
            num_scalar_prefetch=0,
            grid=(grid,),
            in_specs=[
                pl.BlockSpec((tb, 2, w2, c2), lambda i: (i, 0, 0, 0)),
                pl.BlockSpec((c2, c2out), lambda i: (0, 0)),
                pl.BlockSpec((c2, c2out), lambda i: (0, 0)),
                pl.BlockSpec((1, c2out), lambda i: (0, 0)),
                pl.BlockSpec((1, c2out), lambda i: (0, 0)),
            ],
            out_specs=pl.BlockSpec((tb * w2, c2out), lambda i: (i, 0)),
        ),
        compiler_params=pltpu.CompilerParams(
            dimension_semantics=("parallel",),
            vmem_limit_bytes=vmem_limit,
        ),
    )(xr, wa, wb, wsum, bias)


@functools.partial(jax.jit,
                   static_argnames=("input_resolution", "time_dim", "row_tile"))
def patch_merge_forward(x, gamma, beta, weight, *, input_resolution, time_dim,
                        row_tile=None):
    """x: (B, T*H*W, C) -> (B, T*(H//2)*(W//2), 2*C)

    weight: (2C, 4C) — torch nn.Linear convention (out_features, in_features).
    gamma/beta: (4C,) — nn.LayerNorm(4C) parameters.
    """
    H, W = input_resolution
    T = time_dim
    B, L, C = x.shape
    assert L == T * H * W, f"input feature has wrong size: {L} != {T * H * W}"
    assert H % 2 == 0 and W % 2 == 0, f"x size ({H}*{W}) are not even."
    H2, W2 = H // 2, W // 2
    bth2 = B * T * H2
    c2 = 2 * C

    # Free, layout-preserving reshape: (B, T, H, W, C) -> (B*T*H2, 2, W2, 2C).
    xr = x.reshape(bth2, 2, W2, c2)

    # Fold the LayerNorm affine into the reduction weight (tiny, done in f32).
    f32 = jnp.float32
    w_t = weight.astype(f32).T                       # (4C, 2C)
    w_aff = gamma.astype(f32)[:, None] * w_t
    bias = (beta.astype(f32) @ w_t).reshape(1, c2)
    wsum = jnp.sum(w_aff, axis=0).reshape(1, c2)
    # torch concat order is [x0, x1, x2, x3]; split by image-row parity.
    wa = jnp.concatenate([w_aff[0:C], w_aff[2 * C:3 * C]], axis=0).astype(x.dtype)
    wb = jnp.concatenate([w_aff[C:2 * C], w_aff[3 * C:4 * C]], axis=0).astype(x.dtype)

    if row_tile is None:
        tb = _pick_super_row_tile(bth2, W2, c2, c2,
                                  x.dtype.itemsize, x.dtype.itemsize)
    else:
        tb = min(int(row_tile), bth2)
    out = _ln_reduce_pallas(xr, wa, wb, wsum, bias, tb=tb, out_dtype=x.dtype)
    return out.reshape(B, T * H2 * W2, c2)


def _reference_forward(x, gamma, beta, weight, input_resolution, time_dim):
    """Pure-JAX reference mirroring the PyTorch forward loop."""
    H, W = input_resolution
    T = time_dim
    B, L, C = x.shape
    xr = x.reshape(B, T, H * W, C)
    steps = []
    for t in range(T):
        xt = xr[:, t, :, :].reshape(B, H, W, C)
        x0 = xt[:, 0::2, 0::2, :]
        x1 = xt[:, 1::2, 0::2, :]
        x2 = xt[:, 0::2, 1::2, :]
        x3 = xt[:, 1::2, 1::2, :]
        xt = jnp.concatenate([x0, x1, x2, x3], -1)
        mean = jnp.mean(xt, axis=-1, keepdims=True)
        var = jnp.mean((xt - mean) ** 2, axis=-1, keepdims=True)
        xt = (xt - mean) / jnp.sqrt(var + LN_EPS) * gamma + beta
        xt = xt @ weight.T
        steps.append(xt.reshape(B, (H // 2) * (W // 2), 2 * C))
    out = jnp.stack(steps, axis=1)
    return out.reshape(B, T * (H // 2) * (W // 2), 2 * C)


if __name__ == "__main__":
    # Small shapes: B=2, C(dim)=32, H=W=16, T=2 -> x: (2, 2*16*16=512, 32)
    B, C, H, W, T = 2, 32, 16, 16, 2
    key = jax.random.PRNGKey(0)
    kx, kw, kg, kb = jax.random.split(key, 4)

    x = jax.random.normal(kx, (B, T * H * W, C), dtype=jnp.float32)
    # Parameters match nn.Linear(4C, 2C, bias=False) and nn.LayerNorm(4C).
    weight = jax.random.normal(kw, (2 * C, 4 * C), dtype=jnp.float32) * 0.02
    gamma = jnp.ones((4 * C,), dtype=jnp.float32) + 0.01 * jax.random.normal(
        kg, (4 * C,), dtype=jnp.float32)
    beta = 0.01 * jax.random.normal(kb, (4 * C,), dtype=jnp.float32)

    ref = _reference_forward(x, gamma, beta, weight, (H, W), T)

    # Default tiling (single full-extent block at these shapes).
    out = patch_merge_forward(x, gamma, beta, weight,
                              input_resolution=(H, W), time_dim=T)
    out = jax.block_until_ready(out)
    assert out.shape == (B, T * (H // 2) * (W // 2), 2 * C), out.shape
    assert jnp.allclose(out, ref, atol=1e-4, rtol=1e-4), "mismatch (single block)"

    # Exercise a multi-step grid (4 blocks of 8 super-rows) on the same data.
    out2 = patch_merge_forward(x, gamma, beta, weight,
                               input_resolution=(H, W), time_dim=T, row_tile=8)
    out2 = jax.block_until_ready(out2)
    assert jnp.allclose(out2, ref, atol=1e-4, rtol=1e-4), "mismatch (tiled grid)"

    print("KERNEL_OK")
</pallas_src>

<mosaic_0001>
module attributes {stable_mosaic.version = 11 : i64} {
  func.func @_patch_merge_kernel(%arg0: i32, %arg1: memref<32x2x8x64xf32, #tpu.memory_space<vmem>>, %arg2: memref<64x64xf32, #tpu.memory_space<vmem>>, %arg3: memref<64x64xf32, #tpu.memory_space<vmem>>, %arg4: memref<1x64xf32, #tpu.memory_space<vmem>>, %arg5: memref<1x64xf32, #tpu.memory_space<vmem>>, %arg6: memref<256x64xf32, #tpu.memory_space<vmem>>) attributes {dimension_semantics = [#tpu.dimension_semantics<parallel>], iteration_bounds = array<i64: 1>, scalar_prefetch = 0 : i64, scratch_operands = 0 : i64, tpu.core_type = #tpu.core_type<tc>, window_params = [{transform_indices = @transform_0, window_bounds = array<i64: 32, 2, 8, 64>}, {pipeline_mode = #tpu.pipeline_mode<synchronous>, transform_indices = @transform_1, window_bounds = array<i64: 64, 64>}, {pipeline_mode = #tpu.pipeline_mode<synchronous>, transform_indices = @transform_2, window_bounds = array<i64: 64, 64>}, {pipeline_mode = #tpu.pipeline_mode<synchronous>, transform_indices = @transform_3, window_bounds = array<i64: 1, 64>}, {pipeline_mode = #tpu.pipeline_mode<synchronous>, transform_indices = @transform_4, window_bounds = array<i64: 1, 64>}, {transform_indices = @transform_5, window_bounds = array<i64: 256, 64>}]} {
    %c0 = arith.constant 0 : index
    %c0_0 = arith.constant 0 : index
    %c0_1 = arith.constant 0 : index
    %c0_2 = arith.constant 0 : index
    %0 = vector.load %arg1[%c0, %c0_0, %c0_1, %c0_2] : memref<32x2x8x64xf32, #tpu.memory_space<vmem>>, vector<32x1x8x64xf32>
    %1 = vector.shape_cast %0 : vector<32x1x8x64xf32> to vector<32x8x64xf32>
    %2 = vector.shape_cast %1 : vector<32x8x64xf32> to vector<256x64xf32>
    %c0_3 = arith.constant 0 : index
    %c1 = arith.constant 1 : index
    %c0_4 = arith.constant 0 : index
    %c0_5 = arith.constant 0 : index
    %3 = vector.load %arg1[%c0_3, %c1, %c0_4, %c0_5] : memref<32x2x8x64xf32, #tpu.memory_space<vmem>>, vector<32x1x8x64xf32>
    %4 = vector.shape_cast %3 : vector<32x1x8x64xf32> to vector<32x8x64xf32>
    %5 = vector.shape_cast %4 : vector<32x8x64xf32> to vector<256x64xf32>
    %cst = arith.constant dense<0.000000e+00> : vector<256xf32>
    %6 = vector.multi_reduction <add>, %2, %cst [1] : vector<256x64xf32> to vector<256xf32>
    %7 = vector.shape_cast %6 : vector<256xf32> to vector<256x1xf32>
    %cst_6 = arith.constant dense<0.000000e+00> : vector<256xf32>
    %8 = vector.multi_reduction <add>, %5, %cst_6 [1] : vector<256x64xf32> to vector<256xf32>
    %9 = vector.shape_cast %8 : vector<256xf32> to vector<256x1xf32>
    %10 = arith.addf %7, %9 : vector<256x1xf32>
    %11 = arith.mulf %2, %2 : vector<256x64xf32>
    %cst_7 = arith.constant dense<0.000000e+00> : vector<256xf32>
    %12 = vector.multi_reduction <add>, %11, %cst_7 [1] : vector<256x64xf32> to vector<256xf32>
    %13 = vector.shape_cast %12 : vector<256xf32> to vector<256x1xf32>
    %14 = arith.mulf %5, %5 : vector<256x64xf32>
    %cst_8 = arith.constant dense<0.000000e+00> : vector<256xf32>
    %15 = vector.multi_reduction <add>, %14, %cst_8 [1] : vector<256x64xf32> to vector<256xf32>
    %16 = vector.shape_cast %15 : vector<256xf32> to vector<256x1xf32>
    %17 = arith.addf %13, %16 : vector<256x1xf32>
    %cst_9 = arith.constant 7.812500e-03 : f32
    %18 = vector.broadcast %cst_9 : f32 to vector<256x1xf32>
    %19 = arith.mulf %10, %18 : vector<256x1xf32>
    %cst_10 = arith.constant 7.812500e-03 : f32
    %20 = vector.broadcast %cst_10 : f32 to vector<256x1xf32>
    %21 = arith.mulf %17, %20 : vector<256x1xf32>
    %22 = arith.mulf %19, %19 : vector<256x1xf32>
    %23 = arith.subf %21, %22 : vector<256x1xf32>
    %cst_11 = arith.constant 0.000000e+00 : f32
    %24 = vector.broadcast %cst_11 : f32 to vector<256x1xf32>
    %25 = arith.maximumf %23, %24 : vector<256x1xf32>
    %cst_12 = arith.constant 9.99999974E-6 : f32
    %26 = vector.broadcast %cst_12 : f32 to vector<256x1xf32>
    %27 = arith.addf %25, %26 : vector<256x1xf32>
    %28 = math.rsqrt %27 : vector<256x1xf32>
    %c0_13 = arith.constant 0 : index
    %c0_14 = arith.constant 0 : index
    %29 = vector.load %arg2[%c0_13, %c0_14] : memref<64x64xf32, #tpu.memory_space<vmem>>, vector<64x64xf32>
    %cst_15 = arith.constant dense<0.000000e+00> : vector<256x64xf32>
    %30 = tpu.matmul %2, %29, %cst_15 {dimension_numbers = #tpu.dot_dimension_numbers<[1], [0], [0], [1], [0, 0, 1, 1], [], []>} : vector<256x64xf32>, vector<64x64xf32>, vector<256x64xf32> -> vector<256x64xf32>
    %c0_16 = arith.constant 0 : index
    %c0_17 = arith.constant 0 : index
    %31 = vector.load %arg3[%c0_16, %c0_17] : memref<64x64xf32, #tpu.memory_space<vmem>>, vector<64x64xf32>
    %cst_18 = arith.constant dense<0.000000e+00> : vector<256x64xf32>
    %32 = tpu.matmul %5, %31, %cst_18 {dimension_numbers = #tpu.dot_dimension_numbers<[1], [0], [0], [1], [0, 0, 1, 1], [], []>} : vector<256x64xf32>, vector<64x64xf32>, vector<256x64xf32> -> vector<256x64xf32>
    %33 = arith.addf %30, %32 : vector<256x64xf32>
    %c0_19 = arith.constant 0 : index
    %c0_20 = arith.constant 0 : index
    %34 = vector.load %arg4[%c0_19, %c0_20] : memref<1x64xf32, #tpu.memory_space<vmem>>, vector<1x64xf32>
    %35 = vector.broadcast %19 : vector<256x1xf32> to vector<256x64xf32>
    %36 = vector.broadcast %34 : vector<1x64xf32> to vector<256x64xf32>
    %37 = arith.mulf %35, %36 : vector<256x64xf32>
    %38 = arith.subf %33, %37 : vector<256x64xf32>
    %39 = vector.broadcast %28 : vector<256x1xf32> to vector<256x64xf32>
    %40 = arith.mulf %38, %39 : vector<256x64xf32>
    %c0_21 = arith.constant 0 : index
    %c0_22 = arith.constant 0 : index
    %41 = vector.load %arg5[%c0_21, %c0_22] : memref<1x64xf32, #tpu.memory_space<vmem>>, vector<1x64xf32>
    %42 = vector.broadcast %41 : vector<1x64xf32> to vector<256x64xf32>
    %43 = arith.addf %40, %42 : vector<256x64xf32>
    %c0_23 = arith.constant 0 : index
    %c0_24 = arith.constant 0 : index
    %44 = vector.load %arg6[%c0_23, %c0_24] : memref<256x64xf32, #tpu.memory_space<vmem>>, vector<256x64xf32>
    tpu.vector_store %arg6[%c0_23, %c0_24], %43 {strides = array<i32>} : memref<256x64xf32, #tpu.memory_space<vmem>>, vector<256x64xf32>,
    return
  }
  func.func @transform_0(%arg0: i32) -> (i32, i32, i32, i32) {
    %c0_i32 = arith.constant 0 : i32
    %c0_i32_0 = arith.constant 0 : i32
    %c0_i32_1 = arith.constant 0 : i32
    %c0_i32_2 = arith.constant 0 : i32
    return %arg0, %c0_i32, %c0_i32_0, %c0_i32_1 : i32, i32, i32, i32
  }
  func.func @transform_1(%arg0: i32) -> (i32, i32) {
    %c0_i32 = arith.constant 0 : i32
    %c0_i32_0 = arith.constant 0 : i32
    %c0_i32_1 = arith.constant 0 : i32
    return %c0_i32, %c0_i32_0 : i32, i32
  }
  func.func @transform_2(%arg0: i32) -> (i32, i32) {
    %c0_i32 = arith.constant 0 : i32
    %c0_i32_0 = arith.constant 0 : i32
    %c0_i32_1 = arith.constant 0 : i32
    return %c0_i32, %c0_i32_0 : i32, i32
  }
  func.func @transform_3(%arg0: i32) -> (i32, i32) {
    %c0_i32 = arith.constant 0 : i32
    %c0_i32_0 = arith.constant 0 : i32
    %c0_i32_1 = arith.constant 0 : i32
    return %c0_i32, %c0_i32_0 : i32, i32
  }
  func.func @transform_4(%arg0: i32) -> (i32, i32) {
    %c0_i32 = arith.constant 0 : i32
    %c0_i32_0 = arith.constant 0 : i32
    %c0_i32_1 = arith.constant 0 : i32
    return %c0_i32, %c0_i32_0 : i32, i32
  }
  func.func @transform_5(%arg0: i32) -> (i32, i32) {
    %c0_i32 = arith.constant 0 : i32
    %c0_i32_0 = arith.constant 0 : i32
    return %arg0, %c0_i32 : i32, i32
  }
}

</mosaic_0001>

<bundles_post_ra>
// kernel: patch_merge_forward.1
= control target key start
LH: loop header
LB: loop body
LE: loop exit
PB: predicated region body
PF: predicated region fallthrough
CT: control target
= control target key end

     0   :  { %vm85_vm0 = vcmask 523264   ;;  %s3942_s0 = inlined_call_operand.vmem [shape: f32[32,2,8,64], index: 0, kind: input, shape index: {}]   ;;  %s3943_s2 = inlined_call_operand.vmem [shape: f32[64,64], index: 2, kind: input, shape index: {}]   ;;  %s3944_s1 = inlined_call_operand.vmem [shape: f32[64,64], index: 1, kind: input, shape index: {}]   ;;  %s3945_s3 = inlined_call_operand.vmem [shape: f32[1,64], index: 3, kind: input, shape index: {}]   ;;  %s3946_s4 = inlined_call_operand.vmem [shape: f32[1,64], index: 4, kind: input, shape index: {}]   ;;  %s3947_s5 = inlined_call_operand.vmem [shape: f32[256,64], index: 5, kind: output, shape index: {}]  }
   0x1   :  { %v2125_v0 = vld [vmem:[%s3942_s0 + $0x20] sm:$0xff]  ;;  %v831_v5 = vld [vmem:[%s3943_s2 + $0x8] sm:$0xff]  ;;  %v2153_v10 = vld [vmem:[%s3942_s0 + $0x30] sm:$0xff] }
   0x2   :  { %v2130_v1 = vld [vmem:[%s3942_s0] sm:$0xff]  ;;  %v92_v3 = vsel %vm85_vm0, %v2125_v0, 0.0  ;;  %v823_v7 = vld [vmem:[%s3944_s1 + $0x8] sm:$0xff]  ;;  %v2158_v11 = vld [vmem:[%s3942_s0 + $0x10] sm:$0xff]  ;;  %v95_v13 = vsel %vm85_vm0, %v2153_v10, 0.0 }
   0x3   :  { %v830_v2 = vld [vmem:[%s3943_s2] sm:$0xff]  ;;  %v86_v4 = vsel %vm85_vm0, %v2130_v1, 0.0  ;;  %1916 = vmatprep.mubr.msk.f32.mxu0 %vm85_vm0, %v2130_v1  ;;  %93 = vadd.xlane.f32.xlu1 %v92_v3  ;;  %v832_v12 = vld [vmem:[%s3943_s2 + $0x10] sm:$0xff]  ;;  %v89_v14 = vsel %vm85_vm0, %v2158_v11, 0.0  ;;  %v833_v15 = vld [vmem:[%s3943_s2 + $0x18] sm:$0xff] }
   0x4   :  { %v822_v6 = vld [vmem:[%s3944_s1] sm:$0xff]  ;;  %87 = vadd.xlane.f32.xlu0 %v86_v4  ;;  %v1964_v8 = vpack.c.bf16 %v831_v5, %v830_v2  ;;  %v824_v16 = vld [vmem:[%s3944_s1 + $0x10] sm:$0xff]  ;;  %v825_v17 = vld [vmem:[%s3944_s1 + $0x18] sm:$0xff]  ;;  %v1968_v18 = vpack.c.bf16 %v833_v15, %v832_v12 }
   0x5   :  { %v1980_v9 = vpack.c.bf16 %v823_v7, %v822_v6  ;;  %v1984_v19 = vpack.c.bf16 %v825_v17, %v824_v16  ;;  %v2179_v20 = vld [vmem:[%s3942_s0 + $0x50] sm:$0xff]  ;;  %v2184_v21 = vld [vmem:[%s3942_s0 + $0x40] sm:$0xff]  ;;  %v835_v23 = vld [vmem:[%s3943_s2 + $0x28] sm:$0xff] }
   0x6   :  { %1965 = vmatprep.subr.bf16.mxu1 %v1964_v8  ;;  %v834_v22 = vld [vmem:[%s3943_s2 + $0x20] sm:$0xff]  ;;  %v827_v25 = vld [vmem:[%s3944_s1 + $0x28] sm:$0xff]  ;;  %v101_v26 = vsel %vm85_vm0, %v2179_v20, 0.0  ;;  %v98_v27 = vsel %vm85_vm0, %v2184_v21, 0.0  ;;  %v2205_v30 = vld [vmem:[%s3942_s0 + $0x70] sm:$0xff] }
   0x7   :  { %1981 = vmatprep.subr.bf16.mxu0 %v1980_v9  ;;  %1967 = vmatpush3.bf16.msra.mxu1 %v1964_v8  ;;  %v826_v24 = vld [vmem:[%s3944_s1 + $0x20] sm:$0xff]  ;;  %v1972_v28 = vpack.c.bf16 %v835_v23, %v834_v22  ;;  %v836_v32 = vld [vmem:[%s3943_s2 + $0x30] sm:$0xff]  ;;  %v837_v33 = vld [vmem:[%s3943_s2 + $0x38] sm:$0xff]  ;;  %v107_v37 = vsel %vm85_vm0, %v2205_v30, 0.0 }
   0x8   :  { %1983 = vmatpush3.bf16.msra.mxu0 %v1980_v9  ;;  %96 = vadd.xlane.f32.xlu1 %v95_v13  ;;  %v1988_v29 = vpack.c.bf16 %v827_v25, %v826_v24  ;;  %v2210_v31 = vld [vmem:[%s3942_s0 + $0x60] sm:$0xff]  ;;  %v828_v34 = vld [vmem:[%s3944_s1 + $0x30] sm:$0xff]  ;;  %v829_v35 = vld [vmem:[%s3944_s1 + $0x38] sm:$0xff]  ;;  %v1976_v39 = vpack.c.bf16 %v837_v33, %v836_v32 }
   0x9   :  { %90 = vadd.xlane.f32.xlu0 %v89_v14  ;;  %1969 = vmatprep.subr.bf16.mxu1 %v1968_v18  ;;  %v2227_v36 = vld [vmem:[%s3942_s0 + $0x8] sm:$0xff]  ;;  %v104_v38 = vsel %vm85_vm0, %v2210_v31, 0.0  ;;  %v1992_v40 = vpack.c.bf16 %v829_v35, %v828_v34  ;;  %v2238_v41 = vld [vmem:[%s3942_s0 + $0x90] sm:$0xff]  ;;  %v2243_v42 = vld [vmem:[%s3942_s0 + $0x80] sm:$0xff] }
   0xa   :  { %1985 = vmatprep.subr.bf16.mxu0 %v1984_v19  ;;  %1852 = vmatprep.mubr.msk.f32.mxu1 %vm85_vm0, %v2227_v36  ;;  %v113_v43 = vsel %vm85_vm0, %v2238_v41, 0.0  ;;  %v110_v44 = vsel %vm85_vm0, %v2243_v42, 0.0  ;;  %v2252_v45 = vld [vmem:[%s3942_s0 + $0xb0] sm:$0xff]  ;;  %v2257_v46 = vld [vmem:[%s3942_s0 + $0xa0] sm:$0xff]  ;;  %v2262_v47 = vld [vmem:[%s3942_s0 + $0x18] sm:$0xff] }
   0xb   :  { %1971 = vmatpush3.bf16.msra.mxu1 %v1968_v18  ;;  %v2267_v48 = vld [vmem:[%s3942_s0 + $0x28] sm:$0xff]  ;;  %v119_v49 = vsel %vm85_vm0, %v2252_v45, 0.0  ;;  %v116_v50 = vsel %vm85_vm0, %v2257_v46, 0.0  ;;  %v2280_v51 = vld [vmem:[%s3942_s0 + $0xd0] sm:$0xff]  ;;  %v2285_v52 = vld [vmem:[%s3942_s0 + $0xc0] sm:$0xff] }
   0xc   :  { %1987 = vmatpush3.bf16.msra.mxu0 %v1984_v19  ;;  %102 = vadd.xlane.f32.xlu1 %v101_v26  ;;  %4016 = vst [vmem:[#allocation2_spill] sm:$0xff] %v2267_v48  ;;  %v2294_v53 = vld [vmem:[%s3942_s0 + $0x38] sm:$0xff]  ;;  %v2299_v54 = vld [vmem:[%s3942_s0 + $0x48] sm:$0xff]  ;;  %v125_v55 = vsel %vm85_vm0, %v2280_v51, 0.0  ;;  %v122_v56 = vsel %vm85_vm0, %v2285_v52, 0.0  ;;  %v2312_v57 = vld [vmem:[%s3942_s0 + $0xf0] sm:$0xff] }
   0xd   :  { %99 = vadd.xlane.f32.xlu0 %v98_v27  ;;  %1973 = vmatprep.subr.bf16.mxu1 %v1972_v28  ;;  %4017 = vst [vmem:[#allocation3_spill] sm:$0xff] %v2299_v54  ;;  %v2317_v58 = vld [vmem:[%s3942_s0 + $0xe0] sm:$0xff]  ;;  %v2326_v59 = vld [vmem:[%s3942_s0 + $0x58] sm:$0xff]  ;;  %v2331_v60 = vld [vmem:[%s3942_s0 + $0x68] sm:$0xff]  ;;  %v131_v61 = vsel %vm85_vm0, %v2312_v57, 0.0 }
   0xe   :  { %1989 = vmatprep.subr.bf16.mxu0 %v1988_v29  ;;  %4018 = vst [vmem:[#allocation4_spill] sm:$0xff] %v2326_v59  ;;  %4019 = vst [vmem:[#allocation5_spill] sm:$0xff] %v2331_v60  ;;  %v128_v62 = vsel %vm85_vm0, %v2317_v58, 0.0  ;;  %v2344_v63 = vld [vmem:[%s3942_s0 + $0x110] sm:$0xff]  ;;  %v2349_v2 = vld [vmem:[%s3942_s0 + $0x100] sm:$0xff] }
   0xf   :  { %1975 = vmatpush3.bf16.msra.mxu1 %v1972_v28  ;;  %v2358_v3 = vld [vmem:[%s3942_s0 + $0x78] sm:$0xff]  ;;  %v2363_v4 = vld [vmem:[%s3942_s0 + $0x88] sm:$0xff]  ;;  %v137_v5 = vsel %vm85_vm0, %v2344_v63, 0.0  ;;  %v134_v6 = vsel %vm85_vm0, %v2349_v2, 0.0  ;;  %v2376_v7 = vld [vmem:[%s3942_s0 + $0x130] sm:$0xff] }
  0x10   :  { %1991 = vmatpush3.bf16.msra.mxu0 %v1988_v29  ;;  %108 = vadd.xlane.f32.xlu1 %v107_v37  ;;  %4020 = vst [vmem:[#allocation6_spill] sm:$0xff] %v2358_v3  ;;  %4021 = vst [vmem:[#allocation7_spill] sm:$0xff] %v2363_v4  ;;  %v2381_v8 = vld [vmem:[%s3942_s0 + $0x120] sm:$0xff]  ;;  %v2390_v9 = vld [vmem:[%s3942_s0 + $0x98] sm:$0xff]  ;;  %v143_v13 = vsel %vm85_vm0, %v2376_v7, 0.0 }
  0x11   :  { %105 = vadd.xlane.f32.xlu0 %v104_v38  ;;  %1977 = vmatprep.subr.bf16.mxu1 %v1976_v39  ;;  %v2395_v12 = vld [vmem:[%s3942_s0 + $0xa8] sm:$0xff]  ;;  %v140_v14 = vsel %vm85_vm0, %v2381_v8, 0.0  ;;  %v2408_v15 = vld [vmem:[%s3942_s0 + $0x150] sm:$0xff]  ;;  %v2413_v16 = vld [vmem:[%s3942_s0 + $0x140] sm:$0xff] }
  0x12   :  { %1993 = vmatprep.subr.bf16.mxu0 %v1992_v40  ;;  %v2422_v17 = vld [vmem:[%s3942_s0 + $0xb8] sm:$0xff]  ;;  %v2427_v18 = vld [vmem:[%s3942_s0 + $0xc8] sm:$0xff]  ;;  %v149_v19 = vsel %vm85_vm0, %v2408_v15, 0.0  ;;  %v146_v22 = vsel %vm85_vm0, %v2413_v16, 0.0  ;;  %v2440_v23 = vld [vmem:[%s3942_s0 + $0x170] sm:$0xff] }
  0x13   :  { %1979 = vmatpush3.bf16.msra.mxu1 %v1976_v39  ;;  %v2445_v24 = vld [vmem:[%s3942_s0 + $0x160] sm:$0xff]  ;;  %v2454_v25 = vld [vmem:[%s3942_s0 + $0xd8] sm:$0xff]  ;;  %v2459_v26 = vld [vmem:[%s3942_s0 + $0xe8] sm:$0xff]  ;;  %v155_v27 = vsel %vm85_vm0, %v2440_v23, 0.0 }
  0x14   :  { %1995 = vmatpush3.bf16.msra.mxu0 %v1992_v40  ;;  %114 = vadd.xlane.f32.xlu1 %v113_v43  ;;  %v152_v28 = vsel %vm85_vm0, %v2445_v24, 0.0  ;;  %v2472_v29 = vld [vmem:[%s3942_s0 + $0x190] sm:$0xff]  ;;  %v2477_v32 = vld [vmem:[%s3942_s0 + $0x180] sm:$0xff]  ;;  %v2486_v33 = vld [vmem:[%s3942_s0 + $0xf8] sm:$0xff] }
  0x15   :  { %111 = vadd.xlane.f32.xlu0 %v110_v44  ;;  %v2491_v34 = vld [vmem:[%s3942_s0 + $0x108] sm:$0xff]  ;;  %v161_v35 = vsel %vm85_vm0, %v2472_v29, 0.0  ;;  %v158_v37 = vsel %vm85_vm0, %v2477_v32, 0.0  ;;  %v2504_v38 = vld [vmem:[%s3942_s0 + $0x1b0] sm:$0xff]  ;;  %v2509_v39 = vld [vmem:[%s3942_s0 + $0x1a0] sm:$0xff] }
  0x16   :  { %1853 = vmatmul.mubr.msk.f32.vlgmr.msra.gmra.mrb[0].mxu1 %vm85_vm0, %v2262_v47  ;;  %v2518_v40 = vld [vmem:[%s3942_s0 + $0x118] sm:$0xff]  ;;  %v2523_v43 = vld [vmem:[%s3942_s0 + $0x128] sm:$0xff]  ;;  %v167_v44 = vsel %vm85_vm0, %v2504_v38, 0.0 }
  0x17   :  { %1917 = vmatmul.mubr.msk.f32.vlgmr.msra.gmra.mrb[0].mxu0 %vm85_vm0, %v2158_v11  ;;  %1855 = vmatprep.mubr.msk.f32.mxu1 %vm85_vm0, %v2267_v48 }
  0x18   :  { %1919 = vmatprep.mubr.msk.f32.mxu0 %vm85_vm0, %v2125_v0  ;;  %120 = vadd.xlane.f32.xlu1 %v119_v49  ;;  %v164_v49 = vsel %vm85_vm0, %v2509_v39, 0.0 }
  0x19   :  { %117 = vadd.xlane.f32.xlu0 %v116_v50  ;;  %v2536_v50 = vld [vmem:[%s3942_s0 + $0x1d0] sm:$0xff] }
  0x1a   :  { %1856 = vmatmul.mubr.msk.f32.gmra.mrb[2].mxu1 %vm85_vm0, %v2294_v53 }
  0x1b   :  { %1920 = vmatmul.mubr.msk.f32.gmra.mrb[2].mxu0 %vm85_vm0, %v2153_v10  ;;  %1858 = vmatprep.mubr.msk.f32.mxu1 %vm85_vm0, %v2299_v54 }
  0x1c   :  { %1922 = vmatprep.mubr.msk.f32.mxu0 %vm85_vm0, %v2184_v21  ;;  %126 = vadd.xlane.f32.xlu1 %v125_v55  ;;  %v2541_v55 = vld [vmem:[%s3942_s0 + $0x1c0] sm:$0xff] }
  0x1d   :  { %123 = vadd.xlane.f32.xlu0 %v122_v56  ;;  %v2550_v56 = vld [vmem:[%s3942_s0 + $0x138] sm:$0xff] }
  0x1e   :  { %1859 = vmatmul.mubr.msk.f32.gmra.mrb[4].mxu1 %vm85_vm0, %v2326_v59 }
  0x1f   :  { %1923 = vmatmul.mubr.msk.f32.gmra.mrb[4].mxu0 %vm85_vm0, %v2179_v20  ;;  %1861 = vmatprep.mubr.msk.f32.mxu1 %vm85_vm0, %v2331_v60 }
  0x20   :  { %1925 = vmatprep.mubr.msk.f32.mxu0 %vm85_vm0, %v2210_v31  ;;  %132 = vadd.xlane.f32.xlu1 %v131_v61  ;;  %v2555_v61 = vld [vmem:[%s3942_s0 + $0x148] sm:$0xff] }
  0x21   :  { %129 = vadd.xlane.f32.xlu0 %v128_v62  ;;  %v173_v62 = vsel %vm85_vm0, %v2536_v50, 0.0 }
  0x22   :  { %1862 = vmatmul.mubr.msk.f32.gmra.mrb[6].mxu1 %vm85_vm0, %v2358_v3 }
  0x23   :  { %1926 = vmatmul.mubr.msk.f32.gmra.mrb[6].mxu0 %vm85_vm0, %v2205_v30  ;;  %1864 = vmatprep.mubr.msk.f32.mxu1 %vm85_vm0, %v2363_v4 }
  0x24   :  { %1928 = vmatprep.mubr.msk.f32.mxu0 %vm85_vm0, %v2243_v42  ;;  %138 = vadd.xlane.f32.xlu1 %v137_v5  ;;  %v170_v5 = vsel %vm85_vm0, %v2541_v55, 0.0 }
  0x25   :  { %135 = vadd.xlane.f32.xlu0 %v134_v6  ;;  %v2568_v6 = vld [vmem:[%s3942_s0 + $0x1f0] sm:$0xff] }
  0x26   :  { %1865 = vmatmul.mubr.msk.f32.gmra.mrb[8].mxu1 %vm85_vm0, %v2390_v9 }
  0x27   :  { %1929 = vmatmul.mubr.msk.f32.gmra.mrb[8].mxu0 %vm85_vm0, %v2238_v41  ;;  %1867 = vmatprep.mubr.msk.f32.mxu1 %vm85_vm0, %v2395_v12 }
  0x28   :  { %1931 = vmatprep.mubr.msk.f32.mxu0 %vm85_vm0, %v2257_v46  ;;  %144 = vadd.xlane.f32.xlu1 %v143_v13  ;;  %v2573_v13 = vld [vmem:[%s3942_s0 + $0x1e0] sm:$0xff] }
  0x29   :  { %141 = vadd.xlane.f32.xlu0 %v140_v14  ;;  %v2582_v14 = vld [vmem:[%s3942_s0 + $0x158] sm:$0xff] }
  0x2a   :  { %1868 = vmatmul.mubr.msk.f32.gmra.mrb[10].mxu1 %vm85_vm0, %v2422_v17 }
  0x2b   :  { %1932 = vmatmul.mubr.msk.f32.gmra.mrb[10].mxu0 %vm85_vm0, %v2252_v45  ;;  %1870 = vmatprep.mubr.msk.f32.mxu1 %vm85_vm0, %v2427_v18 }
  0x2c   :  { %1934 = vmatprep.mubr.msk.f32.mxu0 %vm85_vm0, %v2285_v52  ;;  %150 = vadd.xlane.f32.xlu1 %v149_v19  ;;  %v2587_v19 = vld [vmem:[%s3942_s0 + $0x168] sm:$0xff] }
  0x2d   :  { %147 = vadd.xlane.f32.xlu0 %v146_v22  ;;  %v179_v22 = vsel %vm85_vm0, %v2568_v6, 0.0 }
  0x2e   :  { %1871 = vmatmul.mubr.msk.f32.gmra.mrb[12].mxu1 %vm85_vm0, %v2454_v25 }
  0x2f   :  { %1935 = vmatmul.mubr.msk.f32.gmra.mrb[12].mxu0 %vm85_vm0, %v2280_v51  ;;  %1873 = vmatprep.mubr.msk.f32.mxu1 %vm85_vm0, %v2459_v26 }
  0x30   :  { %1937 = vmatprep.mubr.msk.f32.mxu0 %vm85_vm0, %v2317_v58  ;;  %156 = vadd.xlane.f32.xlu1 %v155_v27  ;;  %v176_v27 = vsel %vm85_vm0, %v2573_v13, 0.0 }
  0x31   :  { %153 = vadd.xlane.f32.xlu0 %v152_v28  ;;  %v2604_v28 = vld [vmem:[%s3942_s0 + $0x178] sm:$0xff] }
  0x32   :  { %1874 = vmatmul.mubr.msk.f32.gmra.mrb[14].mxu1 %vm85_vm0, %v2486_v33 }
  0x33   :  { %1938 = vmatmul.mubr.msk.f32.gmra.mrb[14].mxu0 %vm85_vm0, %v2312_v57  ;;  %1876 = vmatprep.mubr.msk.f32.mxu1 %vm85_vm0, %v2491_v34 }
  0x34   :  { %1940 = vmatprep.mubr.msk.f32.mxu0 %vm85_vm0, %v2349_v2  ;;  %162 = vadd.xlane.f32.xlu1 %v161_v35  ;;  %v2609_v35 = vld [vmem:[%s3942_s0 + $0x188] sm:$0xff] }
  0x35   :  { %159 = vadd.xlane.f32.xlu0 %v158_v37  ;;  %v185_v37 = vsel %vm85_vm0, %v2262_v47, 0.0 }
  0x36   :  { %1877 = vmatmul.mubr.msk.f32.gmra.mrb[16].mxu1 %vm85_vm0, %v2518_v40 }
  0x37   :  { %1941 = vmatmul.mubr.msk.f32.gmra.mrb[16].mxu0 %vm85_vm0, %v2344_v63  ;;  %1879 = vmatprep.mubr.msk.f32.mxu1 %vm85_vm0, %v2523_v43 }
  0x38   :  { %1943 = vmatprep.mubr.msk.f32.mxu0 %vm85_vm0, %v2381_v8  ;;  %168 = vadd.xlane.f32.xlu1 %v167_v44  ;;  %v182_v44 = vsel %vm85_vm0, %v2227_v36, 0.0 }
  0x39   :  { %165 = vadd.xlane.f32.xlu0 %v164_v49  ;;  %v2626_v49 = vld [vmem:[%s3942_s0 + $0x198] sm:$0xff] }
  0x3a   :  { %1880 = vmatmul.mubr.msk.f32.gmra.mrb[18].mxu1 %vm85_vm0, %v2550_v56 }
  0x3b   :  { %1944 = vmatmul.mubr.msk.f32.gmra.mrb[18].mxu0 %vm85_vm0, %v2376_v7  ;;  %1882 = vmatprep.mubr.msk.f32.mxu1 %vm85_vm0, %v2555_v61 }
  0x3c   :  { %1946 = vmatprep.mubr.msk.f32.mxu0 %vm85_vm0, %v2413_v16  ;;  %174 = vadd.xlane.f32.xlu1 %v173_v62  ;;  %v2631_v62 = vld [vmem:[%s3942_s0 + $0x1a8] sm:$0xff] }
  0x3d   :  { %171 = vadd.xlane.f32.xlu0 %v170_v5  ;;  %v191_v5 = vsel %vm85_vm0, %v2294_v53, 0.0 }
  0x3e   :  { %1883 = vmatmul.mubr.msk.f32.gmra.mrb[20].mxu1 %vm85_vm0, %v2582_v14 }
  0x3f   :  { %1947 = vmatmul.mubr.msk.f32.gmra.mrb[20].mxu0 %vm85_vm0, %v2408_v15  ;;  %1885 = vmatprep.mubr.msk.f32.mxu1 %vm85_vm0, %v2587_v19 }
  0x40   :  { %1949 = vmatprep.mubr.msk.f32.mxu0 %vm85_vm0, %v2445_v24  ;;  %180 = vadd.xlane.f32.xlu1 %v179_v22  ;;  %v188_v22 = vsel %vm85_vm0, %v2267_v48, 0.0  ;;  %v194_v48 = vsel %vm85_vm0, %v2299_v54, 0.0  ;;  %v203_v54 = vsel %vm85_vm0, %v2358_v3, 0.0  ;;  %v215_v3 = vsel %vm85_vm0, %v2422_v17, 0.0 }
  0x41   :  { %177 = vadd.xlane.f32.xlu0 %v176_v27  ;;  %v2648_v27 = vld [vmem:[%s3942_s0 + $0x1b8] sm:$0xff] }
  0x42   :  { %1886 = vmatmul.mubr.msk.f32.gmra.mrb[22].mxu1 %vm85_vm0, %v2604_v28  ;;  %4022 = vst [vmem:[#allocation8_spill] sm:$0xff] %v2648_v27 }
  0x43   :  { %1950 = vmatmul.mubr.msk.f32.gmra.mrb[22].mxu0 %vm85_vm0, %v2440_v23  ;;  %1888 = vmatprep.mubr.msk.f32.mxu1 %vm85_vm0, %v2609_v35 }
  0x44   :  { %1952 = vmatprep.mubr.msk.f32.mxu0 %vm85_vm0, %v2477_v32  ;;  %186 = vadd.xlane.f32.xlu1 %v185_v37  ;;  %v2653_v37 = vld [vmem:[%s3942_s0 + $0x1c8] sm:$0xff] }
  0x45   :  { %183 = vadd.xlane.f32.xlu0 %v182_v44  ;;  %4023 = vst [vmem:[#allocation9_spill] sm:$0xff] %v2653_v37  ;;  %v197_v44 = vsel %vm85_vm0, %v2326_v59, 0.0  ;;  %v200_v59 = vsel %vm85_vm0, %v2331_v60, 0.0  ;;  %v206_v60 = vsel %vm85_vm0, %v2363_v4, 0.0  ;;  %v218_v4 = vsel %vm85_vm0, %v2427_v18, 0.0 }
  0x46   :  { %1889 = vmatmul.mubr.msk.f32.gmra.mrb[24].mxu1 %vm85_vm0, %v2626_v49 }
  0x47   :  { %1953 = vmatmul.mubr.msk.f32.gmra.mrb[24].mxu0 %vm85_vm0, %v2472_v29  ;;  %1891 = vmatprep.mubr.msk.f32.mxu1 %vm85_vm0, %v2631_v62 }
  0x48   :  { %1955 = vmatprep.mubr.msk.f32.mxu0 %vm85_vm0, %v2509_v39  ;;  %192 = vadd.xlane.f32.xlu1 %v191_v5  ;;  %v2670_v5 = vld [vmem:[%s3942_s0 + $0x1d8] sm:$0xff] }
  0x49   :  { %189 = vadd.xlane.f32.xlu0 %v188_v22  ;;  %v2675_v22 = vld [vmem:[%s3942_s0 + $0x1e8] sm:$0xff] }
  0x4a   :  { %1892 = vmatmul.mubr.msk.f32.gmra.mrb[26].mxu1 %vm85_vm0, %v2648_v27  ;;  %4024 = vst [vmem:[#allocation10_spill] sm:$0xff] %v2675_v22 }
  0x4b   :  { %1956 = vmatmul.mubr.msk.f32.gmra.mrb[26].mxu0 %vm85_vm0, %v2504_v38  ;;  %1894 = vmatprep.mubr.msk.f32.mxu1 %vm85_vm0, %v2653_v37 }
  0x4c   :  { %1958 = vmatprep.mubr.msk.f32.mxu0 %vm85_vm0, %v2541_v55  ;;  %198 = vadd.xlane.f32.xlu1 %v197_v44  ;;  %v209_v44 = vsel %vm85_vm0, %v2390_v9, 0.0 }
  0x4d   :  { %195 = vadd.xlane.f32.xlu0 %v194_v48  ;;  %v2692_v48 = vld [vmem:[%s3942_s0 + $0x1f8] sm:$0xff] }
  0x4e   :  { %1895 = vmatmul.mubr.msk.f32.gmra.mrb[28].mxu1 %vm85_vm0, %v2670_v5 }
  0x4f   :  { %1959 = vmatmul.mubr.msk.f32.gmra.mrb[28].mxu0 %vm85_vm0, %v2536_v50  ;;  %1897 = vmatprep.mubr.msk.f32.mxu1 %vm85_vm0, %v2675_v22 }
  0x50   :  { %1961 = vmatprep.mubr.msk.f32.mxu0 %vm85_vm0, %v2573_v13  ;;  %204 = vadd.xlane.f32.xlu1 %v203_v54  ;;  %v212_v54 = vsel %vm85_vm0, %v2395_v12, 0.0 }
  0x51   :  { %201 = vadd.xlane.f32.xlu0 %v200_v59  ;;  %v221_v59 = vsel %vm85_vm0, %v2454_v25, 0.0 }
  0x52   :  { %1898 = vmatmul.mubr.msk.f32.gmra.mrb[30].mxu1 %vm85_vm0, %v2692_v48 }
  0x53   :  { %1962 = vmatmul.mubr.msk.f32.gmra.mrb[30].mxu0 %vm85_vm0, %v2568_v6 }
  0x54   :  { %210 = vadd.xlane.f32.xlu1 %v209_v44  ;;  %v227_v44 = vsel %vm85_vm0, %v2486_v33, 0.0 }
  0x55   :  { %207 = vadd.xlane.f32.xlu0 %v206_v60  ;;  %v224_v60 = vsel %vm85_vm0, %v2459_v26, 0.0 }
  0x58   :  { %216 = vadd.xlane.f32.xlu1 %v215_v3  ;;  %v233_v3 = vsel %vm85_vm0, %v2518_v40, 0.0 }
  0x59   :  { %213 = vadd.xlane.f32.xlu0 %v212_v54  ;;  %v230_v54 = vsel %vm85_vm0, %v2491_v34, 0.0 }
  0x5c   :  { %222 = vadd.xlane.f32.xlu1 %v221_v59  ;;  %v239_v59 = vsel %vm85_vm0, %v2550_v56, 0.0 }
  0x5d   :  { %219 = vadd.xlane.f32.xlu0 %v218_v4  ;;  %v236_v4 = vsel %vm85_vm0, %v2523_v43, 0.0 }
  0x60   :  { %228 = vadd.xlane.f32.xlu1 %v227_v44  ;;  %v245_v44 = vsel %vm85_vm0, %v2582_v14, 0.0 }
  0x61   :  { %225 = vadd.xlane.f32.xlu0 %v224_v60  ;;  %v242_v60 = vsel %vm85_vm0, %v2555_v61, 0.0 }
  0x64   :  { %234 = vadd.xlane.f32.xlu1 %v233_v3  ;;  %v251_v3 = vsel %vm85_vm0, %v2604_v28, 0.0 }
  0x65   :  { %231 = vadd.xlane.f32.xlu0 %v230_v54  ;;  %v248_v54 = vsel %vm85_vm0, %v2587_v19, 0.0 }
  0x68   :  { %240 = vadd.xlane.f32.xlu1 %v239_v59  ;;  %v257_v59 = vsel %vm85_vm0, %v2626_v49, 0.0 }
  0x69   :  { %237 = vadd.xlane.f32.xlu0 %v236_v4  ;;  %v254_v4 = vsel %vm85_vm0, %v2609_v35, 0.0 }
  0x6c   :  { %246 = vadd.xlane.f32.xlu1 %v245_v44  ;;  %v263_v44 = vsel %vm85_vm0, %v2648_v27, 0.0  ;;  %v311_v27 = vmul.f32 %v2158_v11, %v2158_v11 }
  0x6d   :  { %243 = vadd.xlane.f32.xlu0 %v242_v60  ;;  %v260_v60 = vsel %vm85_vm0, %v2631_v62, 0.0 }
  0x70   :  { %252 = vadd.xlane.f32.xlu1 %v251_v3  ;;  %v269_v3 = vsel %vm85_vm0, %v2670_v5, 0.0 }
  0x71   :  { %249 = vadd.xlane.f32.xlu0 %v248_v54  ;;  %v266_v54 = vsel %vm85_vm0, %v2653_v37, 0.0 }
  0x74   :  { %258 = vadd.xlane.f32.xlu1 %v257_v59  ;;  %v275_v59 = vsel %vm85_vm0, %v2692_v48, 0.0 }
  0x75   :  { %255 = vadd.xlane.f32.xlu0 %v254_v4  ;;  %v272_v4 = vsel %vm85_vm0, %v2675_v22, 0.0 }
  0x78   :  { %264 = vadd.xlane.f32.xlu1 %v263_v44  ;;  %v310_v44 = vmul.f32 %v2130_v1, %v2130_v1  ;;  %v315_v1 = vmul.f32 %v2179_v20, %v2179_v20 }
  0x79   :  { %261 = vadd.xlane.f32.xlu0 %v260_v60  ;;  %v345_v60 = vsel %vm85_vm0, %v311_v27, 0.0  ;;  %v314_v27 = vmul.f32 %v2184_v21, %v2184_v21  ;;  %v319_v21 = vmul.f32 %v2238_v41, %v2238_v41 }
  0x7a   :  { %v342_v37 = vsel %vm85_vm0, %v310_v44, 0.0 }
  0x7c   :  { %270 = vadd.xlane.f32.xlu1 %v269_v3  ;;  %v313_v3 = vmul.f32 %v2153_v10, %v2153_v10  ;;  %v354_v10 = vsel %vm85_vm0, %v314_v27, 0.0  ;;  %v323_v27 = vmul.f32 %v2280_v51, %v2280_v51 }
  0x7d   :  { %267 = vadd.xlane.f32.xlu0 %v266_v54  ;;  %v312_v54 = vmul.f32 %v2125_v0, %v2125_v0  ;;  %v317_v0 = vmul.f32 %v2205_v30, %v2205_v30 }
  0x7e   :  { %v351_v22 = vsel %vm85_vm0, %v313_v3, 0.0  ;;  %v321_v3 = vmul.f32 %v2252_v45, %v2252_v45 }
  0x7f   :  { %v348_v11 = vsel %vm85_vm0, %v312_v54, 0.0  ;;  %v320_v54 = vmul.f32 %v2257_v46, %v2257_v46 }
  0x80   :  { %276 = vadd.xlane.f32.xlu1 %v275_v59  ;;  %v357_v59 = vsel %vm85_vm0, %v315_v1, 0.0 }
  0x81   :  { %273 = vadd.xlane.f32.xlu0 %v272_v4  ;;  %v363_v4 = vsel %vm85_vm0, %v317_v0, 0.0  ;;  %v372_v1 = vsel %vm85_vm0, %v320_v54, 0.0  ;;  %v329_v54 = vmul.f32 %v2376_v7, %v2376_v7 }
  0x84   :  { %346 = vadd.xlane.f32.xlu1 %v345_v60 }
  0x85   :  { %343 = vadd.xlane.f32.xlu0 %v342_v37  ;;  %v316_v37 = vmul.f32 %v2210_v31, %v2210_v31  ;;  %v369_v31 = vsel %vm85_vm0, %v319_v21, 0.0 }
  0x87   :  { %v360_v20 = vsel %vm85_vm0, %v316_v37, 0.0  ;;  %v325_v37 = vmul.f32 %v2312_v57, %v2312_v57 }
  0x88   :  { %352 = vadd.xlane.f32.xlu1 %v351_v22  ;;  %v318_v22 = vmul.f32 %v2243_v42, %v2243_v42 }
  0x89   :  { %349 = vadd.xlane.f32.xlu0 %v348_v11  ;;  %v375_v11 = vsel %vm85_vm0, %v321_v3, 0.0 }
  0x8a   :  { %v366_v60 = vsel %vm85_vm0, %v318_v22, 0.0  ;;  %v327_v22 = vmul.f32 %v2344_v63, %v2344_v63 }
  0x8c   :  { %358 = vadd.xlane.f32.xlu1 %v357_v59  ;;  %v322_v59 = vmul.f32 %v2285_v52, %v2285_v52 }
  0x8d   :  { %355 = vadd.xlane.f32.xlu0 %v354_v10  ;;  %v381_v10 = vsel %vm85_vm0, %v323_v27, 0.0 }
  0x8e   :  { %v378_v0 = vsel %vm85_vm0, %v322_v59, 0.0  ;;  %v331_v59 = vmul.f32 %v2408_v15, %v2408_v15 }
  0x90   :  { %364 = vadd.xlane.f32.xlu1 %v363_v4  ;;  %v2774_v44 = vpop.xlane.xlu1 %93  ;;  %v324_v4 = vmul.f32 %v2317_v58, %v2317_v58 }
  0x91   :  { %361 = vadd.xlane.f32.xlu0 %v360_v20  ;;  %v2776_v30 = vpop.xlane.xlu0 %87  ;;  %v387_v20 = vsel %vm85_vm0, %v325_v37, 0.0 }
  0x92   :  { %v384_v21 = vsel %vm85_vm0, %v324_v4, 0.0  ;;  %v333_v4 = vmul.f32 %v2440_v23, %v2440_v23 }
  0x94   :  { %370 = vadd.xlane.f32.xlu1 %v369_v31  ;;  %v326_v31 = vmul.f32 %v2349_v2, %v2349_v2 }
  0x95   :  { %367 = vadd.xlane.f32.xlu0 %v366_v60  ;;  %v2784_v41 = vpop.xlane.xlu1 %96  ;;  %v393_v60 = vsel %vm85_vm0, %v327_v22, 0.0 }
  0x96   :  { %v2786_v42 = vpop.xlane.xlu0 %90  ;;  %v390_v3 = vsel %vm85_vm0, %v326_v31, 0.0  ;;  %v335_v31 = vmul.f32 %v2472_v29, %v2472_v29 }
  0x98   :  { %376 = vadd.xlane.f32.xlu1 %v375_v11  ;;  %v328_v11 = vmul.f32 %v2381_v8, %v2381_v8 }
  0x99   :  { %373 = vadd.xlane.f32.xlu0 %v372_v1  ;;  %v2794_v45 = vpop.xlane.xlu1 %102  ;;  %v399_v1 = vsel %vm85_vm0, %v329_v54, 0.0 }
  0x9a   :  { %v2796_v46 = vpop.xlane.xlu0 %99  ;;  %v396_v27 = vsel %vm85_vm0, %v328_v11, 0.0  ;;  %v337_v11 = vmul.f32 %v2504_v38, %v2504_v38 }
  0x9c   :  { %382 = vadd.xlane.f32.xlu1 %v381_v10  ;;  %v330_v10 = vmul.f32 %v2413_v16, %v2413_v16 }
  0x9d   :  { %379 = vadd.xlane.f32.xlu0 %v378_v0  ;;  %v2804_v51 = vpop.xlane.xlu1 %108  ;;  %v405_v0 = vsel %vm85_vm0, %v331_v59, 0.0 }
  0x9e   :  { %v2806_v52 = vpop.xlane.xlu0 %105  ;;  %v402_v37 = vsel %vm85_vm0, %v330_v10, 0.0  ;;  %v339_v10 = vmul.f32 %v2536_v50, %v2536_v50 }
  0xa0   :  { %388 = vadd.xlane.f32.xlu1 %v387_v20  ;;  %v332_v20 = vmul.f32 %v2445_v24, %v2445_v24 }
  0xa1   :  { %385 = vadd.xlane.f32.xlu0 %v384_v21  ;;  %v2814_v57 = vpop.xlane.xlu1 %114  ;;  %v411_v21 = vsel %vm85_vm0, %v333_v4, 0.0 }
  0xa2   :  { %v2816_v58 = vpop.xlane.xlu0 %111  ;;  %v408_v22 = vsel %vm85_vm0, %v332_v20, 0.0  ;;  %v341_v20 = vmul.f32 %v2568_v6, %v2568_v6 }
  0xa4   :  { %394 = vadd.xlane.f32.xlu1 %v393_v60  ;;  %v334_v60 = vmul.f32 %v2477_v32, %v2477_v32 }
  0xa5   :  { %391 = vadd.xlane.f32.xlu0 %v390_v3  ;;  %v2824_v63 = vpop.xlane.xlu1 %120  ;;  %v417_v3 = vsel %vm85_vm0, %v335_v31, 0.0 }
  0xa6   :  { %v2826_v2 = vpop.xlane.xlu0 %117  ;;  %v414_v54 = vsel %vm85_vm0, %v334_v60, 0.0  ;;  %v439_v60 = vmul.f32 %v2262_v47, %v2262_v47 }
  0xa8   :  { %400 = vadd.xlane.f32.xlu1 %v399_v1  ;;  %v336_v1 = vmul.f32 %v2509_v39, %v2509_v39 }
  0xa9   :  { %397 = vadd.xlane.f32.xlu0 %v396_v27  ;;  %v2834_v7 = vpop.xlane.xlu1 %126  ;;  %v423_v27 = vsel %vm85_vm0, %v337_v11, 0.0 }
  0xaa   :  { %v2836_v8 = vpop.xlane.xlu0 %123  ;;  %v420_v59 = vsel %vm85_vm0, %v336_v1, 0.0  ;;  %v441_v1 = vmul.f32 %v2294_v53, %v2294_v53 }
  0xac   :  { %406 = vadd.xlane.f32.xlu1 %v405_v0  ;;  %v338_v0 = vmul.f32 %v2541_v55, %v2541_v55 }
  0xad   :  { %403 = vadd.xlane.f32.xlu0 %v402_v37  ;;  %v2844_v15 = vpop.xlane.xlu1 %132  ;;  %v429_v37 = vsel %vm85_vm0, %v339_v10, 0.0  ;;  %v479_v10 = vsel %vm85_vm0, %v441_v1, 0.0 }
  0xae   :  { %v2846_v16 = vpop.xlane.xlu0 %129  ;;  %v426_v4 = vsel %vm85_vm0, %v338_v0, 0.0 }
  0xb0   :  { %412 = vadd.xlane.f32.xlu1 %v411_v21  ;;  %v340_v21 = vmul.f32 %v2573_v13, %v2573_v13 }
  0xb1   :  { %409 = vadd.xlane.f32.xlu0 %v408_v22  ;;  %v2854_v23 = vpop.xlane.xlu1 %138  ;;  %v435_v22 = vsel %vm85_vm0, %v341_v20, 0.0  ;;  %v4027_v20 = vld [vmem:[#allocation3_spill] sm:$0xff] }
  0xb2   :  { %v2856_v24 = vpop.xlane.xlu0 %135  ;;  %v432_v31 = vsel %vm85_vm0, %v340_v21, 0.0  ;;  %v442_v21 = vmul.f32 %v4027_v20, %v4027_v20 }
  0xb4   :  { %418 = vadd.xlane.f32.xlu1 %v417_v3  ;;  %v438_v3 = vmul.f32 %v2227_v36, %v2227_v36 }
  0xb5   :  { %415 = vadd.xlane.f32.xlu0 %v414_v54  ;;  %v2864_v29 = vpop.xlane.xlu1 %144  ;;  %v473_v54 = vsel %vm85_vm0, %v439_v60, 0.0  ;;  %v482_v60 = vsel %vm85_vm0, %v442_v21, 0.0 }
  0xb6   :  { %v2866_v32 = vpop.xlane.xlu0 %141  ;;  %v470_v11 = vsel %vm85_vm0, %v438_v3, 0.0  ;;  %v4028_v3 = vld [vmem:[#allocation6_spill] sm:$0xff] }
  0xb8   :  { %424 = vadd.xlane.f32.xlu1 %v423_v27  ;;  %v4025_v27 = vld [vmem:[#allocation2_spill] sm:$0xff] }
  0xb9   :  { %421 = vadd.xlane.f32.xlu0 %v420_v59  ;;  %v2874_v38 = vpop.xlane.xlu1 %150  ;;  %v440_v59 = vmul.f32 %v4025_v27, %v4025_v27 }
  0xba   :  { %v2876_v39 = vpop.xlane.xlu0 %147 }
  0xbb   :  { %v476_v0 = vsel %vm85_vm0, %v440_v59, 0.0 }
  0xbc   :  { %430 = vadd.xlane.f32.xlu1 %v429_v37  ;;  %v4026_v37 = vld [vmem:[#allocation4_spill] sm:$0xff] }
  0xbd   :  { %427 = vadd.xlane.f32.xlu0 %v426_v4  ;;  %v2884_v50 = vpop.xlane.xlu1 %156  ;;  %v443_v4 = vmul.f32 %v4026_v37, %v4026_v37  ;;  %v447_v37 = vmul.f32 %v2390_v9, %v2390_v9 }
  0xbe   :  { %v2886_v55 = vpop.xlane.xlu0 %153 }
  0xc0   :  { %436 = vadd.xlane.f32.xlu1 %v435_v22 }
  0xc1   :  { %433 = vadd.xlane.f32.xlu0 %v432_v31  ;;  %v2894_v6 = vpop.xlane.xlu1 %162  ;;  %v485_v31 = vsel %vm85_vm0, %v443_v4, 0.0  ;;  %v4030_v4 = vld [vmem:[#allocation7_spill] sm:$0xff] }
  0xc2   :  { %v2896_v13 = vpop.xlane.xlu0 %159  ;;  %v446_v20 = vmul.f32 %v4030_v4, %v4030_v4 }
  0xc4   :  { %474 = vadd.xlane.f32.xlu1 %v473_v54  ;;  %v445_v54 = vmul.f32 %v4028_v3, %v4028_v3 }
  0xc5   :  { %471 = vadd.xlane.f32.xlu0 %v470_v11  ;;  %v2904_v47 = vpop.xlane.xlu1 %168  ;;  %v4029_v11 = vld [vmem:[#allocation5_spill] sm:$0xff] }
  0xc6   :  { %v2906_v36 = vpop.xlane.xlu0 %165  ;;  %v444_v1 = vmul.f32 %v4029_v11, %v4029_v11  ;;  %v449_v11 = vmul.f32 %v2422_v17, %v2422_v17  ;;  %v450_v17 = vmul.f32 %v2427_v18, %v2427_v18 }
  0xc8   :  { %480 = vadd.xlane.f32.xlu1 %v479_v10  ;;  %v491_v10 = vsel %vm85_vm0, %v445_v54, 0.0  ;;  %v448_v54 = vmul.f32 %v2395_v12, %v2395_v12  ;;  %v503_v4 = vsel %vm85_vm0, %v449_v11, 0.0 }
  0xc9   :  { %477 = vadd.xlane.f32.xlu0 %v476_v0  ;;  %v2914_v53 = vpop.xlane.xlu1 %174  ;;  %v488_v0 = vsel %vm85_vm0, %v444_v1, 0.0 }
  0xca   :  { %v2916_v22 = vpop.xlane.xlu0 %171 }
  0xcc   :  { %486 = vadd.xlane.f32.xlu1 %v485_v31  ;;  %v497_v31 = vsel %vm85_vm0, %v447_v37, 0.0  ;;  %v500_v37 = vsel %vm85_vm0, %v448_v54, 0.0 }
  0xcd   :  { %483 = vadd.xlane.f32.xlu0 %v482_v60  ;;  %v2924_v27 = vpop.xlane.xlu1 %180  ;;  %v494_v60 = vsel %vm85_vm0, %v446_v20, 0.0  ;;  %v451_v20 = vmul.f32 %v2454_v25, %v2454_v25 }
  0xce   :  { %v2926_v59 = vpop.xlane.xlu0 %177 }
  0xd0   :  { %492 = vadd.xlane.f32.xlu1 %v491_v10 }
  0xd1   :  { %489 = vadd.xlane.f32.xlu0 %v488_v0  ;;  %v187_v21 = vpop.xlane.xlu1 %186 }
  0xd2   :  { %v184_v3 = vpop.xlane.xlu0 %183  ;;  %v279_v1 = vadd.f32 %v187_v21, %v2786_v42  ;;  %v509_v21 = vsel %vm85_vm0, %v451_v20, 0.0 }
  0xd3   :  { %v278_v9 = vadd.f32 %v184_v3, %v2776_v30  ;;  %v506_v3 = vsel %vm85_vm0, %v450_v17, 0.0 }
  0xd4   :  { %498 = vadd.xlane.f32.xlu1 %v497_v31  ;;  %v453_v31 = vmul.f32 %v2486_v33, %v2486_v33  ;;  %v455_v33 = vmul.f32 %v2518_v40, %v2518_v40  ;;  %v457_v40 = vmul.f32 %v2550_v56, %v2550_v56  ;;  %v459_v56 = vmul.f32 %v2582_v14, %v2582_v14 }
  0xd5   :  { %495 = vadd.xlane.f32.xlu0 %v494_v60  ;;  %v193_v10 = vpop.xlane.xlu1 %192  ;;  %v452_v60 = vmul.f32 %v2459_v26, %v2459_v26  ;;  %v454_v26 = vmul.f32 %v2491_v34, %v2491_v34  ;;  %v456_v34 = vmul.f32 %v2523_v43, %v2523_v43  ;;  %v458_v43 = vmul.f32 %v2555_v61, %v2555_v61 }
  0xd6   :  { %v190_v0 = vpop.xlane.xlu0 %189  ;;  %v281_v12 = vadd.f32 %v193_v10, %v2784_v41  ;;  %v515_v54 = vsel %vm85_vm0, %v453_v31, 0.0  ;;  %v521_v20 = vsel %vm85_vm0, %v455_v33, 0.0  ;;  %v2989_v31 = vmul.f32 0.0078125, %v279_v1 }
  0xd7   :  { %v512_v10 = vsel %vm85_vm0, %v452_v60, 0.0  ;;  %v518_v17 = vsel %vm85_vm0, %v454_v26, 0.0  ;;  %v280_v14 = vadd.f32 %v190_v0, %v2774_v44  ;;  %v533_v61 = vsel %vm85_vm0, %v459_v56, 0.0 }
  0xd8   :  { %504 = vadd.xlane.f32.xlu1 %v503_v4  ;;  %v530_v44 = vsel %vm85_vm0, %v458_v43, 0.0  ;;  %v3023_v26 = vmul.f32 0.0078125, %v281_v12  ;;  %v462_v43 = vmul.f32 %v2609_v35, %v2609_v35  ;;  %v464_v35 = vmul.f32 %v2631_v62, %v2631_v62 }
  0xd9   :  { %501 = vadd.xlane.f32.xlu0 %v500_v37  ;;  %v199_v42 = vpop.xlane.xlu1 %198 }
  0xda   :  { %v196_v30 = vpop.xlane.xlu0 %195  ;;  %v2956_v25 = vadd.f32 %v199_v42, %v2794_v45 }
  0xdb   :  { %v2959_v18 = vadd.f32 %v196_v30, %v2796_v46 }
  0xdc   :  { %510 = vadd.xlane.f32.xlu1 %v509_v21  ;;  %v527_v21 = vsel %vm85_vm0, %v457_v40, 0.0 }
  0xdd   :  { %507 = vadd.xlane.f32.xlu0 %v506_v3  ;;  %v205_v41 = vpop.xlane.xlu1 %204  ;;  %v524_v3 = vsel %vm85_vm0, %v456_v34, 0.0  ;;  %v3037_v34 = vmul.f32 0.0078125, %v280_v14 }
  0xde   :  { %v202_v11 = vpop.xlane.xlu0 %201  ;;  %v2968_v45 = vadd.f32 %v205_v41, %v2804_v51 }
  0xdf   :  { %v2971_v46 = vadd.f32 %v202_v11, %v2806_v52 }
  0xe0   :  { %516 = vadd.xlane.f32.xlu1 %v515_v54  ;;  %v461_v54 = vmul.f32 %v2604_v28, %v2604_v28 }
  0xe1   :  { %513 = vadd.xlane.f32.xlu0 %v512_v10  ;;  %v211_v4 = vpop.xlane.xlu1 %210 }
  0xe2   :  { %v208_v37 = vpop.xlane.xlu0 %207  ;;  %v2980_v51 = vadd.f32 %v211_v4, %v2814_v57  ;;  %v2996_v57 = vld [vmem:[%s3945_s3] ss:$0 sm:$0xff] }
  0xe3   :  { %v2983_v52 = vadd.f32 %v208_v37, %v2816_v58  ;;  %v2998_v58 = vmul.f32 0.0078125, %v278_v9  ;;  %v460_v9 = vmul.f32 %v2587_v19, %v2587_v19  ;;  %v463_v19 = vmul.f32 %v2626_v49, %v2626_v49 }
  0xe4   :  { %522 = vadd.xlane.f32.xlu1 %v521_v20  ;;  %v3052_v14 = vmul.f32 %v2996_v57, %v3023_v26 }
  0xe5   :  { %519 = vadd.xlane.f32.xlu0 %v518_v17  ;;  %v217_v42 = vpop.xlane.xlu1 %216  ;;  %v3021_v0 = vmul.f32 %v2996_v57, %v2998_v58  ;;  %v536_v49 = vsel %vm85_vm0, %v460_v9, 0.0  ;;  %v4032_v9 = vld [vmem:[#allocation8_spill] sm:$0xff] }
  0xe6   :  { %v214_v30 = vpop.xlane.xlu0 %213  ;;  %v3001_v60 = vadd.f32 %v217_v42, %v2824_v63  ;;  %v3014_v63 = vmul.f32 %v2996_v57, %v2989_v31  ;;  %4031 = vst [vmem:[#allocation2_spill] sm:$0xff] %v3052_v14 }
  0xe7   :  { %v3004_v41 = vadd.f32 %v214_v30, %v2826_v2  ;;  %v539_v30 = vsel %vm85_vm0, %v461_v54, 0.0  ;;  %v545_v54 = vsel %vm85_vm0, %v463_v19, 0.0 }
  0xe8   :  { %528 = vadd.xlane.f32.xlu1 %v527_v21  ;;  %v3042_v21 = vmul.f32 0.0078125, %v2956_v25 }
  0xe9   :  { %525 = vadd.xlane.f32.xlu0 %v524_v3  ;;  %v1854_v1 = vpop.f32.mrb[0].mxu1  ;;  %v223_v33 = vpop.xlane.xlu1 %222 }
  0xea   :  { %v1918_v11 = vpop.f32.mrb[0].mxu0  ;;  %v1000_v10 = vpop.f32.mrb[1].mxu1  ;;  %v3030_v20 = vadd.f32 %v223_v33, %v2834_v7  ;;  %v3067_v33 = vmul.f32 %v2996_v57, %v3037_v34  ;;  %v3078_v19 = vmul.f32 %v2996_v57, %v3042_v21  ;;  %v548_v7 = vsel %vm85_vm0, %v464_v35, 0.0 }
  0xeb   :  { %v3016_v2 = vadd.f32 %v1918_v11, %v1854_v1  ;;  %v1321_v28 = vpop.f32.mrb[1].mxu0  ;;  %v220_v4 = vpop.xlane.xlu0 %219  ;;  %v3055_v1 = vmul.f32 0.0078125, %v2959_v18 }
  0xec   :  { %v3032_v17 = vadd.f32 %v1321_v28, %v1000_v10  ;;  %v3035_v40 = vadd.f32 %v220_v4, %v2836_v8  ;;  %534 = vadd.xlane.f32.xlu1 %v533_v61  ;;  %v465_v10 = vmul.f32 %v4032_v9, %v4032_v9  ;;  %4033 = vst [vmem:[#allocation4_spill] sm:$0xff] %v3067_v33  ;;  %4035 = vst [vmem:[#allocation6_spill] sm:$0xff] %v3078_v19 }
  0xed   :  { %v1857_v12 = vpop.f32.mrb[2].mxu1  ;;  %531 = vadd.xlane.f32.xlu0 %v530_v44  ;;  %v229_v56 = vpop.xlane.xlu1 %228  ;;  %v3110_v9 = vmul.f32 0.0078125, %v2980_v51 }
  0xee   :  { %v1921_v42 = vpop.f32.mrb[2].mxu0  ;;  %v1010_v8 = vpop.f32.mrb[3].mxu1  ;;  %v3058_v25 = vadd.f32 %v229_v56, %v2844_v15 }
  0xef   :  { %v3046_v3 = vadd.f32 %v1921_v42, %v1857_v12  ;;  %v1331_v11 = vpop.f32.mrb[3].mxu0  ;;  %v226_v61 = vpop.xlane.xlu0 %225 }
  0xf0   :  { %540 = vadd.xlane.f32.xlu1 %v539_v30  ;;  %v3071_v15 = vadd.f32 %v1331_v11, %v1010_v8  ;;  %v3074_v44 = vadd.f32 %v226_v61, %v2846_v16  ;;  %v542_v30 = vsel %vm85_vm0, %v462_v43, 0.0  ;;  %v3085_v8 = vmul.f32 %v2996_v57, %v3055_v1 }
  0xf1   :  { %v1860_v28 = vpop.f32.mrb[4].mxu1  ;;  %537 = vadd.xlane.f32.xlu0 %v536_v49  ;;  %v235_v42 = vpop.xlane.xlu1 %234  ;;  %v3088_v16 = vmul.f32 0.0078125, %v2968_v45  ;;  %v467_v61 = vmul.f32 %v2670_v5, %v2670_v5  ;;  %v3105_v45 = vmul.f32 0.0078125, %v2971_v46  ;;  %v551_v5 = vsel %vm85_vm0, %v465_v10, 0.0 }
  0xf2   :  { %4034 = vst [vmem:[#allocation3_spill] sm:$0xff] %v3071_v15  ;;  %v1924_v4 = vpop.f32.mrb[4].mxu0  ;;  %v1020_v12 = vpop.f32.mrb[5].mxu1  ;;  %4037 = vst [vmem:[#allocation7_spill] sm:$0xff] %v3085_v8  ;;  %v3097_v43 = vadd.f32 %v235_v42, %v2854_v23  ;;  %v4040_v42 = vld [vmem:[#allocation9_spill] sm:$0xff]  ;;  %v3123_v10 = vmul.f32 0.0078125, %v2983_v52 }
  0xf3   :  { %v3080_v62 = vadd.f32 %v1924_v4, %v1860_v28  ;;  %v1341_v56 = vpop.f32.mrb[5].mxu0  ;;  %v232_v11 = vpop.xlane.xlu0 %231  ;;  %v466_v46 = vmul.f32 %v4040_v42, %v4040_v42 }
  0xf4   :  { %v3099_v28 = vadd.f32 %v1341_v56, %v1020_v12  ;;  %v3102_v4 = vadd.f32 %v232_v11, %v2856_v24  ;;  %546 = vadd.xlane.f32.xlu1 %v545_v54  ;;  %v3133_v11 = vmul.f32 %v2996_v57, %v3105_v45 }
  0xf5   :  { %4036 = vst [vmem:[#allocation5_spill] sm:$0xff] %v3080_v62  ;;  %v1863_v49 = vpop.f32.mrb[6].mxu1  ;;  %543 = vadd.xlane.f32.xlu0 %v542_v30  ;;  %v241_v54 = vpop.xlane.xlu1 %240  ;;  %v3120_v30 = vmul.f32 %v2996_v57, %v3088_v16  ;;  %v554_v8 = vsel %vm85_vm0, %v466_v46, 0.0 }
  0xf6   :  { %4038 = vst [vmem:[#allocation8_spill] sm:$0xff] %v3099_v28  ;;  %v1927_v18 = vpop.f32.mrb[6].mxu0  ;;  %v1030_v24 = vpop.f32.mrb[7].mxu1  ;;  %v3126_v51 = vadd.f32 %v241_v54, %v2864_v29  ;;  %4042 = vst [vmem:[#allocation12_spill] sm:$0xff] %v3133_v11  ;;  %v4046_v28 = vld [vmem:[#allocation10_spill] sm:$0xff]  ;;  %v3175_v11 = vmul.f32 0.0078125, %v3030_v20 }
  0xf7   :  { %v3114_v12 = vadd.f32 %v1927_v18, %v1863_v49  ;;  %4041 = vst [vmem:[#allocation9_spill] sm:$0xff] %v3120_v30  ;;  %v1351_v35 = vpop.f32.mrb[7].mxu0  ;;  %v238_v56 = vpop.xlane.xlu0 %237  ;;  %v557_v18 = vsel %vm85_vm0, %v467_v61, 0.0  ;;  %v469_v49 = vmul.f32 %v2692_v48, %v2692_v48  ;;  %v3144_v61 = vmul.f32 %v2996_v57, %v3110_v9 }
  0xf8   :  { %552 = vadd.xlane.f32.xlu1 %v551_v5  ;;  %v3137_v52 = vadd.f32 %v1351_v35, %v1030_v24  ;;  %v3140_v29 = vadd.f32 %v238_v56, %v2866_v32  ;;  %v468_v24 = vmul.f32 %v4046_v28, %v4046_v28  ;;  %v3153_v32 = vmul.f32 %v2996_v57, %v3123_v10 }
  0xf9   :  { %4039 = vst [vmem:[#allocation11_spill] sm:$0xff] %v3114_v12  ;;  %v1866_v54 = vpop.f32.mrb[8].mxu1  ;;  %549 = vadd.xlane.f32.xlu0 %v548_v7  ;;  %4044 = vst [vmem:[#allocation14_spill] sm:$0xff] %v3144_v61  ;;  %v247_v37 = vpop.xlane.xlu1 %246  ;;  %v3156_v35 = vmul.f32 0.0078125, %v3001_v60  ;;  %v3171_v60 = vmul.f32 0.0078125, %v3004_v41  ;;  %v563_v7 = vsel %vm85_vm0, %v469_v49, 0.0 }
  0xfa   :  { %4043 = vst [vmem:[#allocation13_spill] sm:$0xff] %v3137_v52  ;;  %v1930_v23 = vpop.f32.mrb[8].mxu0  ;;  %v1040_v5 = vpop.f32.mrb[9].mxu1  ;;  %4047 = vst [vmem:[#allocation10_spill] sm:$0xff] %v3153_v32  ;;  %v3163_v46 = vadd.f32 %v247_v37, %v2874_v38 }
  0xfb   :  { %v3146_v48 = vadd.f32 %v1930_v23, %v1866_v54  ;;  %v1361_v56 = vpop.f32.mrb[9].mxu0  ;;  %v244_v23 = vpop.xlane.xlu0 %243  ;;  %v3184_v41 = vmul.f32 %v2996_v57, %v3156_v35 }
  0xfc   :  { %v3165_v42 = vadd.f32 %v1361_v56, %v1040_v5  ;;  %v3168_v28 = vadd.f32 %v244_v23, %v2876_v39  ;;  %558 = vadd.xlane.f32.xlu1 %v557_v18  ;;  %v560_v18 = vsel %vm85_vm0, %v468_v24, 0.0 }
  0xfd   :  { %4045 = vst [vmem:[#allocation15_spill] sm:$0xff] %v3146_v48  ;;  %v1869_v30 = vpop.f32.mrb[10].mxu1  ;;  %555 = vadd.xlane.f32.xlu0 %v554_v8  ;;  %v253_v39 = vpop.xlane.xlu1 %252  ;;  %4050 = vst [vmem:[#allocation18_spill] sm:$0xff] %v3184_v41  ;;  %v3187_v8 = vmul.f32 0.0078125, %v3035_v40  ;;  %v3229_v41 = vmul.f32 0.0078125, %v3074_v44 }
  0xfe   :  { %4048 = vst [vmem:[#allocation16_spill] sm:$0xff] %v3165_v42  ;;  %v1933_v12 = vpop.f32.mrb[10].mxu0  ;;  %v1050_v5 = vpop.f32.mrb[11].mxu1  ;;  %v3190_v49 = vadd.f32 %v253_v39, %v2884_v50  ;;  %v3205_v50 = vmul.f32 %v2996_v57, %v3175_v11 }
  0xff   :  { %v3179_v37 = vadd.f32 %v1933_v12, %v1869_v30  ;;  %v1371_v20 = vpop.f32.mrb[11].mxu0  ;;  %v250_v56 = vpop.xlane.xlu0 %249  ;;  %v3194_v12 = vmul.f32 %v2996_v57, %v3171_v60  ;;  %v3211_v32 = vmul.f32 %v2996_v57, %v3187_v8 }
 0x100   :  { %564 = vadd.xlane.f32.xlu1 %v563_v7  ;;  %v3198_v24 = vadd.f32 %v1371_v20, %v1050_v5  ;;  %v3201_v23 = vadd.f32 %v250_v56, %v2886_v55  ;;  %4053 = vst [vmem:[#allocation21_spill] sm:$0xff] %v3205_v50  ;;  %v3214_v5 = vmul.f32 0.0078125, %v3058_v25  ;;  %v3232_v55 = vmul.f32 0.0078125, %v3097_v43 }
 0x101   :  { %4049 = vst [vmem:[#allocation17_spill] sm:$0xff] %v3179_v37  ;;  %4051 = vst [vmem:[#allocation19_spill] sm:$0xff] %v3194_v12  ;;  %v1872_v40 = vpop.f32.mrb[12].mxu1  ;;  %561 = vadd.xlane.f32.xlu0 %v560_v18  ;;  %v259_v54 = vpop.xlane.xlu1 %258 }
 0x102   :  { %4052 = vst [vmem:[#allocation20_spill] sm:$0xff] %v3198_v24  ;;  %v1936_v38 = vpop.f32.mrb[12].mxu0  ;;  %v1060_v39 = vpop.f32.mrb[13].mxu1  ;;  %4055 = vst [vmem:[#allocation23_spill] sm:$0xff] %v3211_v32 }
 0x103   :  { %v3207_v7 = vadd.f32 %v1936_v38, %v1872_v40  ;;  %v1381_v20 = vpop.f32.mrb[13].mxu0  ;;  %v256_v18 = vpop.xlane.xlu0 %255  ;;  %v3221_v38 = vadd.f32 %v259_v54, %v2894_v6 }
 0x104   :  { %v3223_v40 = vadd.f32 %v1381_v20, %v1060_v39  ;;  %v3226_v30 = vadd.f32 %v256_v18, %v2896_v13  ;;  %v3240_v39 = vmul.f32 %v2996_v57, %v3214_v5  ;;  %v3243_v13 = vmul.f32 0.0078125, %v3102_v4 }
 0x105   :  { %4054 = vst [vmem:[#allocation22_spill] sm:$0xff] %v3207_v7  ;;  %v1875_v25 = vpop.f32.mrb[14].mxu1  ;;  %v265_v54 = vpop.xlane.xlu1 %264  ;;  %v3250_v18 = vmul.f32 %v2996_v57, %v3229_v41 }
 0x106   :  { %4056 = vst [vmem:[#allocation24_spill] sm:$0xff] %v3223_v40  ;;  %v1939_v37 = vpop.f32.mrb[14].mxu0  ;;  %v1070_v6 = vpop.f32.mrb[15].mxu1  ;;  %4058 = vst [vmem:[#allocation26_spill] sm:$0xff] %v3240_v39  ;;  %v3246_v44 = vadd.f32 %v265_v54, %v2904_v47  ;;  %v3261_v47 = vmul.f32 %v2996_v57, %v3232_v55  ;;  %v3267_v7 = vmul.f32 %v2996_v57, %v3243_v13 }
 0x107   :  { %v3236_v56 = vadd.f32 %v1939_v37, %v1875_v25  ;;  %v1391_v20 = vpop.f32.mrb[15].mxu0  ;;  %v262_v43 = vpop.xlane.xlu0 %261  ;;  %4059 = vst [vmem:[#allocation27_spill] sm:$0xff] %v3250_v18 }
 0x108   :  { %v3254_v25 = vadd.f32 %v1391_v20, %v1070_v6  ;;  %v3257_v12 = vadd.f32 %v262_v43, %v2906_v36  ;;  %4061 = vst [vmem:[#allocation29_spill] sm:$0xff] %v3261_v47  ;;  %4063 = vst [vmem:[#allocation31_spill] sm:$0xff] %v3267_v7  ;;  %v3270_v6 = vmul.f32 0.0078125, %v3126_v51  ;;  %v3288_v36 = vmul.f32 0.0078125, %v3163_v46 }
 0x109   :  { %4057 = vst [vmem:[#allocation25_spill] sm:$0xff] %v3236_v56  ;;  %v1878_v32 = vpop.f32.mrb[16].mxu1  ;;  %v271_v50 = vpop.xlane.xlu1 %270  ;;  %v3285_v56 = vmul.f32 0.0078125, %v3140_v29 }
 0x10a   :  { %4060 = vst [vmem:[#allocation28_spill] sm:$0xff] %v3254_v25  ;;  %v1942_v4 = vpop.f32.mrb[16].mxu0  ;;  %v1080_v40 = vpop.f32.mrb[17].mxu1 }
 0x10b   :  { %v3263_v54 = vadd.f32 %v1942_v4, %v1878_v32  ;;  %v1401_v20 = vpop.f32.mrb[17].mxu0  ;;  %v268_v43 = vpop.xlane.xlu0 %267  ;;  %v3277_v32 = vadd.f32 %v271_v50, %v2914_v53  ;;  %v3306_v46 = vmul.f32 %v2996_v57, %v3285_v56 }
 0x10c   :  { %v3279_v4 = vadd.f32 %v1401_v20, %v1080_v40  ;;  %v3282_v39 = vadd.f32 %v268_v43, %v2916_v22  ;;  %v3296_v40 = vmul.f32 %v2996_v57, %v3270_v6  ;;  %v3302_v43 = vmul.f32 0.0078125, %v3168_v28 }
 0x10d   :  { %4062 = vst [vmem:[#allocation30_spill] sm:$0xff] %v3263_v54  ;;  %v1881_v51 = vpop.f32.mrb[18].mxu1  ;;  %v277_v50 = vpop.xlane.xlu1 %276  ;;  %4067 = vst [vmem:[#allocation35_spill] sm:$0xff] %v3306_v46  ;;  %v3320_v28 = vmul.f32 0.0078125, %v3190_v49  ;;  %v3346_v46 = vmul.f32 0.0078125, %v3221_v38 }
 0x10e   :  { %4064 = vst [vmem:[#allocation32_spill] sm:$0xff] %v3279_v4  ;;  %v1945_v24 = vpop.f32.mrb[18].mxu0  ;;  %v1090_v53 = vpop.f32.mrb[19].mxu1  ;;  %4066 = vst [vmem:[#allocation34_spill] sm:$0xff] %v3296_v40  ;;  %v3299_v22 = vadd.f32 %v277_v50, %v2924_v27  ;;  %v3317_v50 = vmul.f32 %v2996_v57, %v3288_v36 }
 0x10f   :  { %v3292_v37 = vadd.f32 %v1945_v24, %v1881_v51  ;;  %v1411_v29 = vpop.f32.mrb[19].mxu0  ;;  %v274_v20 = vpop.xlane.xlu0 %273  ;;  %v3335_v24 = vmul.f32 0.0078125, %v3201_v23 }
 0x110   :  { %v3310_v51 = vadd.f32 %v1411_v29, %v1090_v53  ;;  %v3313_v18 = vadd.f32 %v274_v20, %v2926_v59  ;;  %4069 = vst [vmem:[#allocation37_spill] sm:$0xff] %v3317_v50  ;;  %v3332_v20 = vmul.f32 %v2996_v57, %v3302_v43  ;;  %v3343_v53 = vmul.f32 %v2996_v57, %v3320_v28 }
 0x111   :  { %4065 = vst [vmem:[#allocation33_spill] sm:$0xff] %v3292_v37  ;;  %v1884_v7 = vpop.f32.mrb[20].mxu1  ;;  %v3324_v54 = vpop.xlane.xlu1 %346  ;;  %v3361_v50 = vmul.f32 0.0078125, %v3226_v30 }
 0x112   :  { %4068 = vst [vmem:[#allocation36_spill] sm:$0xff] %v3310_v51  ;;  %v1948_v27 = vpop.f32.mrb[20].mxu0  ;;  %v1100_v47 = vpop.f32.mrb[21].mxu1  ;;  %4071 = vst [vmem:[#allocation39_spill] sm:$0xff] %v3332_v20  ;;  %v3369_v51 = vmul.f32 %v2996_v57, %v3346_v46  ;;  %v3372_v20 = vmul.f32 0.0078125, %v3246_v44 }
 0x113   :  { %v3322_v4 = vadd.f32 %v1948_v27, %v1884_v7  ;;  %v1421_v29 = vpop.f32.mrb[21].mxu0  ;;  %v3328_v59 = vpop.xlane.xlu0 %343  ;;  %4073 = vst [vmem:[#allocation41_spill] sm:$0xff] %v3343_v53  ;;  %v3387_v53 = vmul.f32 0.0078125, %v3257_v12 }
 0x114   :  { %v3339_v7 = vadd.f32 %v1421_v29, %v1100_v47  ;;  %v3358_v29 = vmul.f32 %v2996_v57, %v3335_v24  ;;  %4077 = vst [vmem:[#allocation45_spill] sm:$0xff] %v3369_v51  ;;  %v3413_v51 = vmul.f32 0.0078125, %v3282_v39 }
 0x115   :  { %4070 = vst [vmem:[#allocation38_spill] sm:$0xff] %v3322_v4  ;;  %v1887_v27 = vpop.f32.mrb[22].mxu1  ;;  %v3352_v25 = vpop.xlane.xlu1 %352 }
 0x116   :  { %4072 = vst [vmem:[#allocation40_spill] sm:$0xff] %v3339_v7  ;;  %v1951_v40 = vpop.f32.mrb[22].mxu0  ;;  %v1110_v23 = vpop.f32.mrb[23].mxu1  ;;  %4075 = vst [vmem:[#allocation43_spill] sm:$0xff] %v3358_v29  ;;  %v3395_v7 = vmul.f32 %v2996_v57, %v3372_v20  ;;  %v3398_v29 = vmul.f32 0.0078125, %v3277_v32 }
 0x117   :  { %v3350_v37 = vadd.f32 %v1951_v40, %v1887_v27  ;;  %v1431_v49 = vpop.f32.mrb[23].mxu0  ;;  %v3354_v47 = vpop.xlane.xlu0 %349 }
 0x118   :  { %v3365_v4 = vadd.f32 %v1431_v49, %v1110_v23  ;;  %v3384_v23 = vmul.f32 %v2996_v57, %v3361_v50  ;;  %4081 = vst [vmem:[#allocation49_spill] sm:$0xff] %v3395_v7  ;;  %v3439_v7 = vmul.f32 0.0078125, %v3313_v18 }
 0x119   :  { %4074 = vst [vmem:[#allocation42_spill] sm:$0xff] %v3350_v37  ;;  %v1890_v40 = vpop.f32.mrb[24].mxu1  ;;  %v3378_v61 = vpop.xlane.xlu1 %358 }
 0x11a   :  { %4076 = vst [vmem:[#allocation44_spill] sm:$0xff] %v3365_v4  ;;  %v1954_v27 = vpop.f32.mrb[24].mxu0  ;;  %v1120_v30 = vpop.f32.mrb[25].mxu1  ;;  %4079 = vst [vmem:[#allocation47_spill] sm:$0xff] %v3384_v23  ;;  %v3421_v4 = vmul.f32 %v2996_v57, %v3398_v29  ;;  %v3424_v23 = vmul.f32 0.0078125, %v3299_v22 }
 0x11b   :  { %v3376_v42 = vadd.f32 %v1954_v27, %v1890_v40  ;;  %v1441_v38 = vpop.f32.mrb[25].mxu0  ;;  %v3380_v49 = vpop.xlane.xlu0 %355 }
 0x11c   :  { %v3391_v37 = vadd.f32 %v1441_v38, %v1120_v30  ;;  %v3410_v30 = vmul.f32 %v2996_v57, %v3387_v53  ;;  %4085 = vst [vmem:[#allocation53_spill] sm:$0xff] %v3421_v4 }
 0x11d   :  { %4078 = vst [vmem:[#allocation46_spill] sm:$0xff] %v3376_v42  ;;  %v1893_v40 = vpop.f32.mrb[26].mxu1  ;;  %v3404_v52 = vpop.xlane.xlu1 %364 }
 0x11e   :  { %4080 = vst [vmem:[#allocation48_spill] sm:$0xff] %v3391_v37  ;;  %v1957_v27 = vpop.f32.mrb[26].mxu0  ;;  %v1130_v12 = vpop.f32.mrb[27].mxu1  ;;  %4083 = vst [vmem:[#allocation51_spill] sm:$0xff] %v3410_v30  ;;  %v3447_v37 = vmul.f32 %v2996_v57, %v3424_v23 }
 0x11f   :  { %v3402_v48 = vadd.f32 %v1957_v27, %v1893_v40  ;;  %v1451_v44 = vpop.f32.mrb[27].mxu0  ;;  %v3406_v38 = vpop.xlane.xlu0 %361 }
 0x120   :  { %v3417_v42 = vadd.f32 %v1451_v44, %v1130_v12  ;;  %v3436_v12 = vmul.f32 %v2996_v57, %v3413_v51  ;;  %4089 = vst [vmem:[#allocation57_spill] sm:$0xff] %v3447_v37 }
 0x121   :  { %4082 = vst [vmem:[#allocation50_spill] sm:$0xff] %v3402_v48  ;;  %v1896_v40 = vpop.f32.mrb[28].mxu1  ;;  %v3430_v62 = vpop.xlane.xlu1 %370 }
 0x122   :  { %4084 = vst [vmem:[#allocation52_spill] sm:$0xff] %v3417_v42  ;;  %v1960_v27 = vpop.f32.mrb[28].mxu0  ;;  %v1140_v39 = vpop.f32.mrb[29].mxu1  ;;  %4087 = vst [vmem:[#allocation55_spill] sm:$0xff] %v3436_v12 }
 0x123   :  { %v3428_v19 = vadd.f32 %v1960_v27, %v1896_v40  ;;  %v1461_v32 = vpop.f32.mrb[29].mxu0  ;;  %v3432_v44 = vpop.xlane.xlu0 %367 }
 0x124   :  { %v3443_v48 = vadd.f32 %v1461_v32, %v1140_v39  ;;  %v3459_v32 = vmul.f32 %v2996_v57, %v3439_v7 }
 0x125   :  { %4086 = vst [vmem:[#allocation54_spill] sm:$0xff] %v3428_v19  ;;  %v1899_v40 = vpop.f32.mrb[30].mxu1  ;;  %v3453_v15 = vpop.xlane.xlu1 %376 }
 0x126   :  { %4088 = vst [vmem:[#allocation56_spill] sm:$0xff] %v3443_v48  ;;  %v1963_v27 = vpop.f32.mrb[30].mxu0  ;;  %v1150_v33 = vpop.f32.mrb[31].mxu1  ;;  %4091 = vst [vmem:[#allocation59_spill] sm:$0xff] %v3459_v32 }
 0x127   :  { %v3451_v42 = vadd.f32 %v1963_v27, %v1899_v40  ;;  %v1471_v18 = vpop.f32.mrb[31].mxu0  ;;  %v3455_v14 = vpop.xlane.xlu0 %373 }
 0x128   :  { %v3463_v22 = vadd.f32 %v1471_v18, %v1150_v33 }
 0x129   :  { %4090 = vst [vmem:[#allocation58_spill] sm:$0xff] %v3451_v42  ;;  %v3467_v40 = vpop.xlane.xlu1 %382 }
 0x12a   :  { %4092 = vst [vmem:[#allocation60_spill] sm:$0xff] %v3463_v22 }
 0x12b   :  { %v3469_v27 = vpop.xlane.xlu0 %379 }
 0x12d   :  { %v3471_v12 = vpop.xlane.xlu1 %388 }
 0x12f   :  { %v3473_v48 = vpop.xlane.xlu0 %385 }
 0x131   :  { %v3475_v4 = vpop.xlane.xlu1 %394 }
 0x132   :  { %4093 = vst [vmem:[#allocation61_spill] sm:$0xff] %v3475_v4 }
 0x133   :  { %v3477_v57 = vpop.xlane.xlu0 %391 }
 0x134   :  { %4094 = vst [vmem:[#allocation62_spill] sm:$0xff] %v3477_v57 }
 0x135   :  { %v3479_v19 = vpop.xlane.xlu1 %400 }
 0x136   :  { %4095 = vst [vmem:[#allocation63_spill] sm:$0xff] %v3479_v19 }
 0x137   :  { %v3481_v39 = vpop.xlane.xlu0 %397 }
 0x138   :  { %4096 = vst [vmem:[#allocation64_spill] sm:$0xff] %v3481_v39 }
 0x139   :  { %v3483_v33 = vpop.xlane.xlu1 %406 }
 0x13a   :  { %4097 = vst [vmem:[#allocation65_spill] sm:$0xff] %v3483_v33 }
 0x13b   :  { %v3485_v18 = vpop.xlane.xlu0 %403 }
 0x13c   :  { %4098 = vst [vmem:[#allocation66_spill] sm:$0xff] %v3485_v18 }
 0x13d   :  { %v3487_v30 = vpop.xlane.xlu1 %412 }
 0x13f   :  { %v3489_v32 = vpop.xlane.xlu0 %409 }
 0x140   :  { %4099 = vst [vmem:[#allocation67_spill] sm:$0xff] %v3489_v32  ;;  %v663_v32 = vmul.f32 %v2989_v31, %v2989_v31  ;;  %v666_v31 = vmul.f32 %v3055_v1, %v3055_v1  ;;  %v3539_v1 = vmul.f32 %v3156_v35, %v3156_v35  ;;  %v3556_v35 = vmul.f32 %v3214_v5, %v3214_v5 }
 0x141   :  { %v3491_v22 = vpop.xlane.xlu1 %418  ;;  %v3573_v5 = vmul.f32 %v3270_v6, %v3270_v6 }
 0x142   :  { %4100 = vst [vmem:[#allocation68_spill] sm:$0xff] %v3491_v22  ;;  %v662_v22 = vmul.f32 %v2998_v58, %v2998_v58  ;;  %v3523_v58 = vmul.f32 %v3088_v16, %v3088_v16 }
 0x143   :  { %v3493_v37 = vpop.xlane.xlu0 %415 }
 0x144   :  { %4101 = vst [vmem:[#allocation69_spill] sm:$0xff] %v3493_v37 }
 0x145   :  { %v3495_v42 = vpop.xlane.xlu1 %424 }
 0x146   :  { %4102 = vst [vmem:[#allocation70_spill] sm:$0xff] %v3495_v42 }
 0x147   :  { %v3497_v4 = vpop.xlane.xlu0 %421 }
 0x148   :  { %4103 = vst [vmem:[#allocation71_spill] sm:$0xff] %v3497_v4  ;;  %v665_v4 = vmul.f32 %v3023_v26, %v3023_v26 }
 0x149   :  { %v3499_v57 = vpop.xlane.xlu1 %430 }
 0x14a   :  { %4104 = vst [vmem:[#allocation72_spill] sm:$0xff] %v3499_v57  ;;  %v3561_v57 = vmul.f32 %v3229_v41, %v3229_v41  ;;  %v3577_v41 = vmul.f32 %v3285_v56, %v3285_v56 }
 0x14b   :  { %v3501_v19 = vpop.xlane.xlu0 %427 }
 0x14c   :  { %4105 = vst [vmem:[#allocation73_spill] sm:$0xff] %v3501_v19  ;;  %v664_v19 = vmul.f32 %v3037_v34, %v3037_v34  ;;  %v3531_v34 = vmul.f32 %v3110_v9, %v3110_v9 }
 0x14d   :  { %v3503_v39 = vpop.xlane.xlu1 %436 }
 0x14e   :  { %4106 = vst [vmem:[#allocation74_spill] sm:$0xff] %v3503_v39  ;;  %v667_v39 = vmul.f32 %v3042_v21, %v3042_v21  ;;  %v3535_v21 = vmul.f32 %v3123_v10, %v3123_v10  ;;  %v3552_v10 = vmul.f32 %v3187_v8, %v3187_v8  ;;  %v3569_v8 = vmul.f32 %v3243_v13, %v3243_v13 }
 0x14f   :  { %v3505_v33 = vpop.xlane.xlu0 %433  ;;  %v3582_v13 = vmul.f32 %v3288_v36, %v3288_v36 }
 0x150   :  { %4107 = vst [vmem:[#allocation75_spill] sm:$0xff] %v3505_v33 }
 0x151   :  { %v475_v18 = vpop.xlane.xlu1 %474 }
 0x152   :  { %v567_v37 = vadd.f32 %v475_v18, %v3324_v54  ;;  %v3527_v54 = vmul.f32 %v3105_v45, %v3105_v45  ;;  %v3547_v45 = vmul.f32 %v3175_v11, %v3175_v11  ;;  %v3565_v11 = vmul.f32 %v3232_v55, %v3232_v55 }
 0x153   :  { %v472_v42 = vpop.xlane.xlu0 %471 }
 0x154   :  { %v566_v33 = vadd.f32 %v472_v42, %v3328_v59  ;;  %v631_v26 = vmul.f32 0.0078125, %v567_v37  ;;  %v3543_v59 = vmul.f32 %v3171_v60, %v3171_v60 }
 0x155   :  { %v481_v16 = vpop.xlane.xlu1 %480 }
 0x156   :  { %v630_v42 = vmul.f32 0.0078125, %v566_v33  ;;  %v695_v9 = vsub.f32 %v631_v26, %v663_v32  ;;  %v569_v37 = vadd.f32 %v481_v16, %v3352_v25 }
 0x157   :  { %v478_v18 = vpop.xlane.xlu0 %477 }
 0x158   :  { %v694_v33 = vsub.f32 %v630_v42, %v662_v22  ;;  %v568_v60 = vadd.f32 %v478_v18, %v3354_v47  ;;  %v727_v25 = vmax.f32 %v695_v9, 0.0  ;;  %v633_v32 = vmul.f32 0.0078125, %v569_v37 }
 0x159   :  { %v487_v26 = vpop.xlane.xlu1 %486 }
 0x15a   :  { %v726_v22 = vmax.f32 %v694_v33, 0.0  ;;  %v632_v47 = vmul.f32 0.0078125, %v568_v60  ;;  %v759_v42 = vadd.f32 1e-05, %v727_v25  ;;  %v697_v55 = vsub.f32 %v633_v32, %v665_v4 }
 0x15b   :  { %v571_v16 = vadd.f32 %v487_v26, %v3378_v61  ;;  %v484_v9 = vpop.xlane.xlu0 %483  ;;  %v3587_v33 = vmul.f32 %v3302_v43, %v3302_v43  ;;  %v3591_v4 = vmul.f32 %v3320_v28, %v3320_v28 }
 0x15c   :  { %v758_v37 = vadd.f32 1e-05, %v726_v22  ;;  %v696_v18 = vsub.f32 %v632_v47, %v664_v19  ;;  %v570_v6 = vadd.f32 %v484_v9, %v3380_v49  ;;  %2028 = vrsqrt.f32 %v759_v42 }
 0x15d   :  { %v729_v56 = vmax.f32 %v697_v55, 0.0  ;;  %v635_v60 = vmul.f32 0.0078125, %v571_v16  ;;  %v493_v36 = vpop.xlane.xlu1 %492  ;;  %v3595_v19 = vmul.f32 %v3335_v24, %v3335_v24  ;;  %v3600_v47 = vmul.f32 %v3346_v46, %v3346_v46 }
 0x15e   :  { %2030 = vrsqrt.f32 %v758_v37  ;;  %v728_v61 = vmax.f32 %v696_v18, 0.0  ;;  %v634_v25 = vmul.f32 0.0078125, %v570_v6  ;;  %v573_v43 = vadd.f32 %v493_v36, %v3404_v52 }
 0x15f   :  { %v761_v49 = vadd.f32 1e-05, %v729_v56  ;;  %v699_v32 = vsub.f32 %v635_v60, %v667_v39  ;;  %v490_v22 = vpop.xlane.xlu0 %489  ;;  %v3605_v55 = vmul.f32 %v3361_v50, %v3361_v50  ;;  %v3609_v39 = vmul.f32 %v3372_v20, %v3372_v20 }
 0x160   :  { %v760_v26 = vadd.f32 1e-05, %v728_v61  ;;  %v698_v28 = vsub.f32 %v634_v25, %v666_v31  ;;  %v572_v42 = vadd.f32 %v490_v22, %v3406_v38  ;;  %v637_v16 = vmul.f32 0.0078125, %v573_v43 }
 0x161   :  { %2032 = vrsqrt.f32 %v761_v49  ;;  %v731_v24 = vmax.f32 %v699_v32, 0.0  ;;  %v499_v46 = vpop.xlane.xlu1 %498  ;;  %v3613_v31 = vmul.f32 %v3387_v53, %v3387_v53  ;;  %v3619_v6 = vmul.f32 %v3398_v29, %v3398_v29 }
 0x162   :  { %2034 = vrsqrt.f32 %v760_v26  ;;  %v730_v52 = vmax.f32 %v698_v28, 0.0  ;;  %v636_v9 = vmul.f32 0.0078125, %v572_v42  ;;  %v701_v37 = vsub.f32 %v637_v16, %v3523_v58 }
 0x163   :  { %v763_v38 = vadd.f32 1e-05, %v731_v24  ;;  %v575_v50 = vadd.f32 %v499_v46, %v3430_v62  ;;  %v496_v18 = vpop.xlane.xlu0 %495  ;;  %v3625_v61 = vmul.f32 %v3413_v51, %v3413_v51  ;;  %v3629_v62 = vmul.f32 %v3424_v23, %v3424_v23  ;;  %v3638_v51 = vld [vmem:[%s3946_s4] ss:$0 sm:$0xff] }
 0x164   :  { %v762_v20 = vadd.f32 1e-05, %v730_v52  ;;  %v700_v56 = vsub.f32 %v636_v9, %v3527_v54  ;;  %v574_v60 = vadd.f32 %v496_v18, %v3432_v44  ;;  %v733_v53 = vmax.f32 %v701_v37, 0.0 }
 0x165   :  { %2036 = vrsqrt.f32 %v763_v38  ;;  %v639_v25 = vmul.f32 0.0078125, %v575_v50  ;;  %v505_v36 = vpop.xlane.xlu1 %504  ;;  %v3633_v54 = vmul.f32 %v3439_v7, %v3439_v7  ;;  %v4108_v26 = vsub.f32 %v3016_v2, %v3014_v63 }
 0x166   :  { %2038 = vrsqrt.f32 %v762_v20  ;;  %v732_v58 = vmax.f32 %v700_v56, 0.0  ;;  %v638_v29 = vmul.f32 0.0078125, %v574_v60  ;;  %v2029_v49 = vpop.eup %2028  ;;  %v765_v44 = vadd.f32 1e-05, %v733_v53 }
 0x167   :  { %v703_v32 = vsub.f32 %v639_v25, %v3531_v34  ;;  %v577_v23 = vadd.f32 %v505_v36, %v3453_v15  ;;  %v502_v43 = vpop.xlane.xlu0 %501  ;;  %v1552_v28 = vmul.f32 %v2029_v49, %v4108_v26  ;;  %v4109_v16 = vsub.f32 %v3032_v17, %v3021_v0  ;;  %v4110_v17 = vld [vmem:[#allocation2_spill] sm:$0xff] }
 0x168   :  { %v2031_v22 = vpop.eup %2030  ;;  %v764_v42 = vadd.f32 1e-05, %v732_v58  ;;  %v702_v7 = vsub.f32 %v638_v29, %v3535_v21  ;;  %v576_v24 = vadd.f32 %v502_v43, %v3455_v14  ;;  %2040 = vrsqrt.f32 %v765_v44 }
 0x169   :  { %v1551_v52 = vmul.f32 %v2031_v22, %v4109_v16  ;;  %v735_v9 = vmax.f32 %v703_v32, 0.0  ;;  %v641_v34 = vmul.f32 0.0078125, %v577_v23  ;;  %v1591_v15 = vadd.f32 %v3638_v51, %v1552_v28  ;;  %v511_v37 = vpop.xlane.xlu1 %510 }
 0x16a   :  { %2042 = vrsqrt.f32 %v764_v42  ;;  %v734_v46 = vmax.f32 %v702_v7, 0.0  ;;  %v640_v38 = vmul.f32 0.0078125, %v576_v24  ;;  %v579_v14 = vadd.f32 %v511_v37, %v3467_v40  ;;  %v4112_v40 = vld [vmem:[#allocation3_spill] sm:$0xff]  ;;  %v4115_v7 = vld [vmem:[#allocation5_spill] sm:$0xff]  ;;  %v4116_v24 = vld [vmem:[#allocation6_spill] sm:$0xff] }
 0x16b   :  { %v2033_v63 = vpop.eup %2032  ;;  %v1590_v2 = vadd.f32 %v3638_v51, %v1551_v52  ;;  %v767_v50 = vadd.f32 1e-05, %v735_v9  ;;  %v705_v21 = vsub.f32 %v641_v34, %v3539_v1  ;;  %v508_v18 = vpop.xlane.xlu0 %507  ;;  %1623 = vst.msk [vmem:[%s3947_s5 + $0x8] sm:$0xff] %vm85_vm0, %v1591_v15  ;;  %v4111_v20 = vsub.f32 %v3046_v3, %v4110_v17  ;;  %v4113_v1 = vld [vmem:[#allocation4_spill] sm:$0xff]  ;;  %v4121_v17 = vld [vmem:[#allocation61_spill] sm:$0xff] }
 0x16c   :  { %v2035_v0 = vpop.eup %2034  ;;  %v766_v60 = vadd.f32 1e-05, %v734_v46  ;;  %v704_v53 = vsub.f32 %v640_v38, %v3543_v59  ;;  %v578_v25 = vadd.f32 %v508_v18, %v3469_v27  ;;  %v4114_v58 = vsub.f32 %v4112_v40, %v4113_v1 }
 0x16d   :  { %v1554_v56 = vmul.f32 %v2033_v63, %v4111_v20  ;;  %1622 = vst.msk [vmem:[%s3947_s5] sm:$0xff] %vm85_vm0, %v1590_v2  ;;  %2044 = vrsqrt.f32 %v767_v50  ;;  %v737_v36 = vmax.f32 %v705_v21, 0.0  ;;  %v643_v49 = vmul.f32 0.0078125, %v579_v14  ;;  %v517_v59 = vpop.xlane.xlu1 %516 }
 0x16e   :  { %v1553_v29 = vmul.f32 %v2035_v0, %v4114_v58  ;;  %2046 = vrsqrt.f32 %v766_v60  ;;  %v736_v44 = vmax.f32 %v704_v53, 0.0  ;;  %v642_v32 = vmul.f32 0.0078125, %v578_v25  ;;  %v4122_v53 = vld [vmem:[#allocation11_spill] sm:$0xff]  ;;  %v4123_v25 = vld [vmem:[#allocation9_spill] sm:$0xff] }
 0x16f   :  { %v1593_v3 = vadd.f32 %v3638_v51, %v1554_v56  ;;  %v2037_v23 = vpop.eup %2036  ;;  %v769_v43 = vadd.f32 1e-05, %v737_v36  ;;  %v707_v22 = vsub.f32 %v643_v49, %v3547_v45  ;;  %v581_v26 = vadd.f32 %v517_v59, %v3471_v12  ;;  %v514_v28 = vpop.xlane.xlu0 %513  ;;  %v4118_v12 = vld [vmem:[#allocation8_spill] sm:$0xff]  ;;  %v4119_v45 = vld [vmem:[#allocation7_spill] sm:$0xff]  ;;  %v4125_v36 = vld [vmem:[#allocation62_spill] sm:$0xff] }
 0x170   :  { %v1592_v27 = vadd.f32 %v3638_v51, %v1553_v29  ;;  %v2039_v42 = vpop.eup %2038  ;;  %v4117_v16 = vsub.f32 %v4115_v7, %v4116_v24  ;;  %v768_v9 = vadd.f32 1e-05, %v736_v44  ;;  %v706_v34 = vsub.f32 %v642_v32, %v3552_v10  ;;  %v4129_v24 = vld [vmem:[#allocation63_spill] sm:$0xff] }
 0x171   :  { %1625 = vst.msk [vmem:[%s3947_s5 + $0x18] sm:$0xff] %vm85_vm0, %v1593_v3  ;;  %v580_v15 = vadd.f32 %v514_v28, %v3473_v48  ;;  %v4120_v46 = vsub.f32 %v4118_v12, %v4119_v45  ;;  %2048 = vrsqrt.f32 %v769_v43  ;;  %v739_v37 = vmax.f32 %v707_v22, 0.0  ;;  %v523_v10 = vpop.xlane.xlu1 %522  ;;  %v4127_v3 = vld [vmem:[#allocation12_spill] sm:$0xff] }
 0x172   :  { %v1556_v52 = vmul.f32 %v2037_v23, %v4117_v16  ;;  %1624 = vst.msk [vmem:[%s3947_s5 + $0x10] sm:$0xff] %vm85_vm0, %v1592_v27  ;;  %v645_v63 = vmul.f32 0.0078125, %v581_v26  ;;  %2050 = vrsqrt.f32 %v768_v9  ;;  %v738_v50 = vmax.f32 %v706_v34, 0.0  ;;  %v2041_v14 = vpop.eup %2040  ;;  %v4130_v34 = vld [vmem:[#allocation15_spill] sm:$0xff] }
 0x173   :  { %v1555_v38 = vmul.f32 %v2039_v42, %v4120_v46  ;;  %v644_v21 = vmul.f32 0.0078125, %v580_v15  ;;  %v771_v18 = vadd.f32 1e-05, %v739_v37  ;;  %v583_v20 = vadd.f32 %v523_v10, %v4121_v17  ;;  %v520_v56 = vpop.xlane.xlu0 %519  ;;  %v4131_v15 = vld [vmem:[#allocation14_spill] sm:$0xff]  ;;  %v4133_v37 = vld [vmem:[#allocation64_spill] sm:$0xff] }
 0x174   :  { %v1595_v2 = vadd.f32 %v3638_v51, %v1556_v52  ;;  %v709_v0 = vsub.f32 %v645_v63, %v3556_v35  ;;  %v2043_v60 = vpop.eup %2042  ;;  %v4124_v40 = vsub.f32 %v4122_v53, %v4123_v25  ;;  %v770_v58 = vadd.f32 1e-05, %v738_v50  ;;  %v4126_v35 = vld [vmem:[#allocation13_spill] sm:$0xff] }
 0x175   :  { %v1594_v48 = vadd.f32 %v3638_v51, %v1555_v38  ;;  %v708_v29 = vsub.f32 %v644_v21, %v3561_v57  ;;  %v582_v49 = vadd.f32 %v520_v56, %v4125_v36  ;;  %v4128_v44 = vsub.f32 %v4126_v35, %v4127_v3  ;;  %v529_v57 = vpop.xlane.xlu1 %528  ;;  %v4137_v53 = vld [vmem:[#allocation65_spill] sm:$0xff] }
 0x176   :  { %1627 = vst.msk [vmem:[%s3947_s5 + $0x28] sm:$0xff] %vm85_vm0, %v1595_v2  ;;  %v1558_v1 = vmul.f32 %v2041_v14, %v4124_v40  ;;  %2052 = vrsqrt.f32 %v771_v18  ;;  %v741_v59 = vmax.f32 %v709_v0, 0.0  ;;  %v647_v23 = vmul.f32 0.0078125, %v583_v20  ;;  %v4135_v2 = vld [vmem:[#allocation10_spill] sm:$0xff] }
 0x177   :  { %1626 = vst.msk [vmem:[%s3947_s5 + $0x20] sm:$0xff] %vm85_vm0, %v1594_v48  ;;  %v1557_v32 = vmul.f32 %v2043_v60, %v4128_v44  ;;  %2054 = vrsqrt.f32 %v770_v58  ;;  %v740_v43 = vmax.f32 %v708_v29, 0.0  ;;  %v646_v22 = vmul.f32 0.0078125, %v582_v49  ;;  %v2045_v26 = vpop.eup %2044  ;;  %v526_v52 = vpop.xlane.xlu0 %525  ;;  %v4138_v58 = vld [vmem:[#allocation17_spill] sm:$0xff]  ;;  %v4139_v29 = vld [vmem:[#allocation18_spill] sm:$0xff] }
 0x178   :  { %v1597_v27 = vadd.f32 %v3638_v51, %v1558_v1  ;;  %v773_v42 = vadd.f32 1e-05, %v741_v59  ;;  %v711_v7 = vsub.f32 %v647_v23, %v3565_v11  ;;  %v585_v16 = vadd.f32 %v529_v57, %v4129_v24  ;;  %v2047_v9 = vpop.eup %2046  ;;  %v4134_v11 = vld [vmem:[#allocation16_spill] sm:$0xff]  ;;  %v4141_v44 = vld [vmem:[#allocation66_spill] sm:$0xff]  ;;  %v4143_v59 = vld [vmem:[#allocation19_spill] sm:$0xff] }
 0x179   :  { %v1596_v28 = vadd.f32 %v3638_v51, %v1557_v32  ;;  %v4132_v12 = vsub.f32 %v4130_v34, %v4131_v15  ;;  %v772_v46 = vadd.f32 1e-05, %v740_v43  ;;  %v710_v38 = vsub.f32 %v646_v22, %v3569_v8  ;;  %v535_v8 = vpop.xlane.xlu1 %534  ;;  %v4145_v15 = vld [vmem:[#allocation22_spill] sm:$0xff] }
 0x17a   :  { %1629 = vst.msk [vmem:[%s3947_s5 + $0x38] sm:$0xff] %vm85_vm0, %v1597_v27  ;;  %v584_v63 = vadd.f32 %v526_v52, %v4133_v37  ;;  %v4136_v50 = vsub.f32 %v4134_v11, %v4135_v2  ;;  %2056 = vrsqrt.f32 %v773_v42  ;;  %v743_v10 = vmax.f32 %v711_v7, 0.0 }
 0x17b   :  { %v1560_v45 = vmul.f32 %v2045_v26, %v4132_v12  ;;  %1628 = vst.msk [vmem:[%s3947_s5 + $0x30] sm:$0xff] %vm85_vm0, %v1596_v28  ;;  %v649_v14 = vmul.f32 0.0078125, %v585_v16  ;;  %2058 = vrsqrt.f32 %v772_v46  ;;  %v742_v18 = vmax.f32 %v710_v38, 0.0  ;;  %v2049_v17 = vpop.eup %2048  ;;  %v532_v40 = vpop.xlane.xlu0 %531  ;;  %v4146_v12 = vld [vmem:[#allocation21_spill] sm:$0xff] }
 0x17c   :  { %v1559_v21 = vmul.f32 %v2047_v9, %v4136_v50  ;;  %v648_v0 = vmul.f32 0.0078125, %v584_v63  ;;  %v775_v56 = vadd.f32 1e-05, %v743_v10  ;;  %v587_v25 = vadd.f32 %v535_v8, %v4137_v53  ;;  %v2051_v1 = vpop.eup %2050  ;;  %v4148_v63 = vld [vmem:[#allocation67_spill] sm:$0xff] }
 0x17d   :  { %v1599_v48 = vadd.f32 %v3638_v51, %v1560_v45  ;;  %v713_v60 = vsub.f32 %v649_v14, %v3573_v5  ;;  %v4140_v36 = vsub.f32 %v4138_v58, %v4139_v29  ;;  %v774_v35 = vadd.f32 1e-05, %v742_v18  ;;  %v4142_v5 = vld [vmem:[#allocation20_spill] sm:$0xff] }
 0x17e   :  { %v1598_v20 = vadd.f32 %v3638_v51, %v1559_v21  ;;  %v712_v3 = vsub.f32 %v648_v0, %v3577_v41  ;;  %v586_v32 = vadd.f32 %v532_v40, %v4141_v44  ;;  %v4144_v23 = vsub.f32 %v4142_v5, %v4143_v59  ;;  %v541_v41 = vpop.xlane.xlu1 %540  ;;  %v4153_v40 = vld [vmem:[#allocation25_spill] sm:$0xff]  ;;  %v4158_v44 = vld [vmem:[#allocation27_spill] sm:$0xff] }
 0x17f   :  { %1631 = vst.msk [vmem:[%s3947_s5 + $0x48] sm:$0xff] %vm85_vm0, %v1599_v48  ;;  %v1562_v49 = vmul.f32 %v2049_v17, %v4140_v36  ;;  %2060 = vrsqrt.f32 %v775_v56  ;;  %v745_v43 = vmax.f32 %v713_v60, 0.0  ;;  %v651_v22 = vmul.f32 0.0078125, %v587_v25  ;;  %v538_v9 = vpop.xlane.xlu0 %537  ;;  %v4152_v56 = vld [vmem:[#allocation68_spill] sm:$0xff] }
 0x180   :  { %1630 = vst.msk [vmem:[%s3947_s5 + $0x40] sm:$0xff] %vm85_vm0, %v1598_v20  ;;  %v1561_v27 = vmul.f32 %v2051_v1, %v4144_v23  ;;  %2062 = vrsqrt.f32 %v774_v35  ;;  %v744_v26 = vmax.f32 %v712_v3, 0.0  ;;  %v650_v28 = vmul.f32 0.0078125, %v586_v32  ;;  %v2053_v42 = vpop.eup %2052  ;;  %v4154_v1 = vld [vmem:[#allocation26_spill] sm:$0xff]  ;;  %v4156_v35 = vld [vmem:[#allocation69_spill] sm:$0xff] }
 0x181   :  { %v1601_v57 = vadd.f32 %v3638_v51, %v1562_v49  ;;  %v777_v24 = vadd.f32 1e-05, %v745_v43  ;;  %v715_v16 = vsub.f32 %v651_v22, %v3582_v13  ;;  %v589_v52 = vadd.f32 %v541_v41, %v3487_v30  ;;  %v2055_v34 = vpop.eup %2054  ;;  %v4149_v30 = vld [vmem:[#allocation24_spill] sm:$0xff]  ;;  %v4150_v13 = vld [vmem:[#allocation23_spill] sm:$0xff] }
 0x182   :  { %v1600_v7 = vadd.f32 %v3638_v51, %v1561_v27  ;;  %v4147_v45 = vsub.f32 %v4145_v15, %v4146_v12  ;;  %v776_v38 = vadd.f32 1e-05, %v744_v26  ;;  %v714_v37 = vsub.f32 %v650_v28, %v3587_v33  ;;  %v547_v33 = vpop.xlane.xlu1 %546 }
 0x183   :  { %1633 = vst.msk [vmem:[%s3947_s5 + $0x58] sm:$0xff] %vm85_vm0, %v1601_v57  ;;  %v588_v11 = vadd.f32 %v538_v9, %v4148_v63  ;;  %v4151_v2 = vsub.f32 %v4149_v30, %v4150_v13  ;;  %2064 = vrsqrt.f32 %v777_v24  ;;  %v747_v21 = vmax.f32 %v715_v16, 0.0  ;;  %v544_v53 = vpop.xlane.xlu0 %543  ;;  %v4162_v9 = vld [vmem:[#allocation29_spill] sm:$0xff] }
 0x184   :  { %v1564_v46 = vmul.f32 %v2053_v42, %v4147_v45  ;;  %1632 = vst.msk [vmem:[%s3947_s5 + $0x50] sm:$0xff] %vm85_vm0, %v1600_v7  ;;  %v653_v10 = vmul.f32 0.0078125, %v589_v52  ;;  %2066 = vrsqrt.f32 %v776_v38  ;;  %v746_v48 = vmax.f32 %v714_v37, 0.0  ;;  %v2057_v0 = vpop.eup %2056  ;;  %v4160_v42 = vld [vmem:[#allocation70_spill] sm:$0xff]  ;;  %v4166_v37 = vld [vmem:[#allocation31_spill] sm:$0xff] }
 0x185   :  { %v1563_v50 = vmul.f32 %v2055_v34, %v4151_v2  ;;  %v652_v18 = vmul.f32 0.0078125, %v588_v11  ;;  %v779_v17 = vadd.f32 1e-05, %v747_v21  ;;  %v591_v60 = vadd.f32 %v547_v33, %v4152_v56  ;;  %v2059_v25 = vpop.eup %2058  ;;  %v4161_v52 = vld [vmem:[#allocation30_spill] sm:$0xff]  ;;  %v4168_v33 = vld [vmem:[#allocation72_spill] sm:$0xff] }
 0x186   :  { %v1603_v14 = vadd.f32 %v3638_v51, %v1564_v46  ;;  %v717_v20 = vsub.f32 %v653_v10, %v3591_v4  ;;  %v4155_v58 = vsub.f32 %v4153_v40, %v4154_v1  ;;  %v778_v36 = vadd.f32 1e-05, %v746_v48  ;;  %v4157_v4 = vld [vmem:[#allocation28_spill] sm:$0xff]  ;;  %v4164_v46 = vld [vmem:[#allocation71_spill] sm:$0xff]  ;;  %v4170_v56 = vld [vmem:[#allocation34_spill] sm:$0xff] }
 0x187   :  { %v1602_v8 = vadd.f32 %v3638_v51, %v1563_v50  ;;  %v716_v49 = vsub.f32 %v652_v18, %v3595_v19  ;;  %v590_v3 = vadd.f32 %v544_v53, %v4156_v35  ;;  %v4159_v32 = vsub.f32 %v4157_v4, %v4158_v44  ;;  %v553_v19 = vpop.xlane.xlu1 %552  ;;  %v550_v24 = vpop.xlane.xlu0 %549  ;;  %v4172_v1 = vld [vmem:[#allocation73_spill] sm:$0xff] }
 0x188   :  { %1635 = vst.msk [vmem:[%s3947_s5 + $0x68] sm:$0xff] %vm85_vm0, %v1603_v14  ;;  %v1566_v29 = vmul.f32 %v2057_v0, %v4155_v58  ;;  %2068 = vrsqrt.f32 %v779_v17  ;;  %v749_v59 = vmax.f32 %v717_v20, 0.0  ;;  %v655_v23 = vmul.f32 0.0078125, %v591_v60  ;;  %v4169_v20 = vld [vmem:[#allocation33_spill] sm:$0xff] }
 0x189   :  { %1634 = vst.msk [vmem:[%s3947_s5 + $0x60] sm:$0xff] %vm85_vm0, %v1602_v8  ;;  %v1565_v5 = vmul.f32 %v2059_v25, %v4159_v32  ;;  %2070 = vrsqrt.f32 %v778_v36  ;;  %v748_v43 = vmax.f32 %v716_v49, 0.0  ;;  %v654_v22 = vmul.f32 0.0078125, %v590_v3  ;;  %v2061_v57 = vpop.eup %2060 }
 0x18a   :  { %v1605_v27 = vadd.f32 %v3638_v51, %v1566_v29  ;;  %v781_v28 = vadd.f32 1e-05, %v749_v59  ;;  %v719_v41 = vsub.f32 %v655_v23, %v3600_v47  ;;  %v593_v7 = vadd.f32 %v553_v19, %v4160_v42  ;;  %v2063_v16 = vpop.eup %2062  ;;  %v4165_v47 = vld [vmem:[#allocation32_spill] sm:$0xff]  ;;  %v4174_v29 = vld [vmem:[#allocation35_spill] sm:$0xff] }
 0x18b   :  { %v1604_v26 = vadd.f32 %v3638_v51, %v1565_v5  ;;  %v4163_v34 = vsub.f32 %v4161_v52, %v4162_v9  ;;  %v780_v12 = vadd.f32 1e-05, %v748_v43  ;;  %v718_v45 = vsub.f32 %v654_v22, %v3605_v55  ;;  %v559_v55 = vpop.xlane.xlu1 %558  ;;  %v556_v8 = vpop.xlane.xlu0 %555  ;;  %v4176_v43 = vld [vmem:[#allocation74_spill] sm:$0xff]  ;;  %v4182_v9 = vld [vmem:[#allocation39_spill] sm:$0xff] }
 0x18c   :  { %1637 = vst.msk [vmem:[%s3947_s5 + $0x78] sm:$0xff] %vm85_vm0, %v1605_v27  ;;  %v592_v38 = vadd.f32 %v550_v24, %v4164_v46  ;;  %v4167_v63 = vsub.f32 %v4165_v47, %v4166_v37  ;;  %2072 = vrsqrt.f32 %v781_v28  ;;  %v751_v30 = vmax.f32 %v719_v41, 0.0  ;;  %v4178_v28 = vld [vmem:[#allocation37_spill] sm:$0xff] }
 0x18d   :  { %v1568_v15 = vmul.f32 %v2061_v57, %v4163_v34  ;;  %1636 = vst.msk [vmem:[%s3947_s5 + $0x70] sm:$0xff] %vm85_vm0, %v1604_v26  ;;  %v657_v13 = vmul.f32 0.0078125, %v593_v7  ;;  %2074 = vrsqrt.f32 %v780_v12  ;;  %v750_v50 = vmax.f32 %v718_v45, 0.0  ;;  %v2065_v10 = vpop.eup %2064  ;;  %v4177_v26 = vld [vmem:[#allocation38_spill] sm:$0xff] }
 0x18e   :  { %v1567_v11 = vmul.f32 %v2063_v16, %v4167_v63  ;;  %v656_v21 = vmul.f32 0.0078125, %v592_v38  ;;  %v783_v48 = vadd.f32 1e-05, %v751_v30  ;;  %v595_v0 = vadd.f32 %v559_v55, %v4168_v33  ;;  %v2067_v17 = vpop.eup %2066  ;;  %v4180_v16 = vld [vmem:[#allocation75_spill] sm:$0xff] }
 0x18f   :  { %v1607_v2 = vadd.f32 %v3638_v51, %v1568_v15  ;;  %v721_v18 = vsub.f32 %v657_v13, %v3609_v39  ;;  %v4171_v60 = vsub.f32 %v4169_v20, %v4170_v56  ;;  %v782_v25 = vadd.f32 1e-05, %v750_v50  ;;  %v4173_v39 = vld [vmem:[#allocation36_spill] sm:$0xff]  ;;  %v562_v19 = vpop.xlane.xlu0 %561  ;;  %v4184_v13 = vld [vmem:[#allocation42_spill] sm:$0xff] }
 0x190   :  { %v1606_v14 = vadd.f32 %v3638_v51, %v1567_v11  ;;  %v720_v40 = vsub.f32 %v656_v21, %v3613_v31  ;;  %v594_v58 = vadd.f32 %v556_v8, %v4172_v1  ;;  %v4175_v36 = vsub.f32 %v4173_v39, %v4174_v29  ;;  %v565_v31 = vpop.xlane.xlu1 %564  ;;  %v4194_v39 = vld [vmem:[#allocation47_spill] sm:$0xff] }
 0x191   :  { %1639 = vst.msk [vmem:[%s3947_s5 + $0x88] sm:$0xff] %vm85_vm0, %v1607_v2  ;;  %v1570_v53 = vmul.f32 %v2065_v10, %v4171_v60  ;;  %2076 = vrsqrt.f32 %v783_v48  ;;  %v753_v35 = vmax.f32 %v721_v18, 0.0  ;;  %v659_v3 = vmul.f32 0.0078125, %v595_v0  ;;  %v4185_v2 = vld [vmem:[#allocation41_spill] sm:$0xff]  ;;  %v4190_v60 = vld [vmem:[#allocation46_spill] sm:$0xff] }
 0x192   :  { %1638 = vst.msk [vmem:[%s3947_s5 + $0x80] sm:$0xff] %vm85_vm0, %v1606_v14  ;;  %v1569_v49 = vmul.f32 %v2067_v17, %v4175_v36  ;;  %2078 = vrsqrt.f32 %v782_v25  ;;  %v752_v44 = vmax.f32 %v720_v40, 0.0  ;;  %v658_v32 = vmul.f32 0.0078125, %v594_v58  ;;  %v2069_v5 = vpop.eup %2068  ;;  %v4187_v14 = vld [vmem:[#allocation44_spill] sm:$0xff] }
 0x193   :  { %v1609_v4 = vadd.f32 %v3638_v51, %v1570_v53  ;;  %v785_v23 = vadd.f32 1e-05, %v753_v35  ;;  %v723_v27 = vsub.f32 %v659_v3, %v3619_v6  ;;  %v597_v22 = vadd.f32 %v565_v31, %v4176_v43  ;;  %v2071_v57 = vpop.eup %2070  ;;  %v4181_v6 = vld [vmem:[#allocation40_spill] sm:$0xff]  ;;  %v4191_v53 = vld [vmem:[#allocation45_spill] sm:$0xff] }
 0x194   :  { %v1608_v59 = vadd.f32 %v3638_v51, %v1569_v49  ;;  %v4179_v41 = vsub.f32 %v4177_v26, %v4178_v28  ;;  %v784_v7 = vadd.f32 1e-05, %v752_v44  ;;  %v722_v24 = vsub.f32 %v658_v32, %v3625_v61  ;;  %v4193_v58 = vld [vmem:[#allocation48_spill] sm:$0xff]  ;;  %v4196_v44 = vld [vmem:[#allocation50_spill] sm:$0xff]  ;;  %v4197_v32 = vld [vmem:[#allocation49_spill] sm:$0xff] }
 0x195   :  { %1641 = vst.msk [vmem:[%s3947_s5 + $0x98] sm:$0xff] %vm85_vm0, %v1609_v4  ;;  %v596_v52 = vadd.f32 %v562_v19, %v4180_v16  ;;  %v4183_v34 = vsub.f32 %v4181_v6, %v4182_v9  ;;  %2080 = vrsqrt.f32 %v785_v23  ;;  %v755_v12 = vmax.f32 %v723_v27, 0.0  ;;  %v4200_v23 = vld [vmem:[#allocation51_spill] sm:$0xff]  ;;  %v4202_v28 = vld [vmem:[#allocation54_spill] sm:$0xff] }
 0x196   :  { %v1572_v42 = vmul.f32 %v2069_v5, %v4179_v41  ;;  %1640 = vst.msk [vmem:[%s3947_s5 + $0x90] sm:$0xff] %vm85_vm0, %v1608_v59  ;;  %v661_v45 = vmul.f32 0.0078125, %v597_v22  ;;  %2082 = vrsqrt.f32 %v784_v7  ;;  %v754_v38 = vmax.f32 %v722_v24, 0.0  ;;  %v2073_v61 = vpop.eup %2072  ;;  %v4199_v59 = vld [vmem:[#allocation52_spill] sm:$0xff]  ;;  %v4203_v41 = vld [vmem:[#allocation53_spill] sm:$0xff]  ;;  %v4206_v16 = vld [vmem:[#allocation55_spill] sm:$0xff] }
 0x197   :  { %v1571_v15 = vmul.f32 %v2071_v57, %v4183_v34  ;;  %v660_v47 = vmul.f32 0.0078125, %v596_v52  ;;  %v787_v63 = vadd.f32 1e-05, %v755_v12  ;;  %v2075_v30 = vpop.eup %2074  ;;  %v4186_v50 = vsub.f32 %v4184_v13, %v4185_v2  ;;  %v4205_v24 = vld [vmem:[#allocation56_spill] sm:$0xff] }
 0x198   :  { %v1611_v46 = vadd.f32 %v3638_v51, %v1572_v42  ;;  %v725_v11 = vsub.f32 %v661_v45, %v3629_v62  ;;  %v786_v55 = vadd.f32 1e-05, %v754_v38  ;;  %v4188_v62 = vld [vmem:[#allocation43_spill] sm:$0xff]  ;;  %v4192_v25 = vsub.f32 %v4190_v60, %v4191_v53  ;;  %v4208_v45 = vld [vmem:[#allocation58_spill] sm:$0xff] }
 0x199   :  { %v1610_v37 = vadd.f32 %v3638_v51, %v1571_v15  ;;  %v1574_v21 = vmul.f32 %v2073_v61, %v4186_v50  ;;  %v724_v10 = vsub.f32 %v660_v47, %v3633_v54  ;;  %v4189_v48 = vsub.f32 %v4187_v14, %v4188_v62  ;;  %v4211_v61 = vld [vmem:[#allocation60_spill] sm:$0xff] }
 0x19a   :  { %1643 = vst.msk [vmem:[%s3947_s5 + $0xa8] sm:$0xff] %vm85_vm0, %v1611_v46  ;;  %2084 = vrsqrt.f32 %v787_v63  ;;  %v757_v33 = vmax.f32 %v725_v11, 0.0  ;;  %v4195_v29 = vsub.f32 %v4193_v58, %v4194_v39  ;;  %v4198_v31 = vsub.f32 %v4196_v44, %v4197_v32  ;;  %v4209_v46 = vld [vmem:[#allocation57_spill] sm:$0xff] }
 0x19b   :  { %1642 = vst.msk [vmem:[%s3947_s5 + $0xa0] sm:$0xff] %vm85_vm0, %v1610_v37  ;;  %v1573_v18 = vmul.f32 %v2075_v30, %v4189_v48  ;;  %v1613_v0 = vadd.f32 %v3638_v51, %v1574_v21  ;;  %2086 = vrsqrt.f32 %v786_v55  ;;  %v756_v8 = vmax.f32 %v724_v10, 0.0  ;;  %v2077_v17 = vpop.eup %2076  ;;  %v4212_v37 = vld [vmem:[#allocation59_spill] sm:$0xff] }
 0x19c   :  { %v789_v56 = vadd.f32 1e-05, %v757_v33  ;;  %v2079_v54 = vpop.eup %2078  ;;  %v1576_v40 = vmul.f32 %v2077_v17, %v4192_v25  ;;  %v4201_v27 = vsub.f32 %v4199_v59, %v4200_v23  ;;  %v4204_v42 = vsub.f32 %v4202_v28, %v4203_v41 }
 0x19d   :  { %v1612_v20 = vadd.f32 %v3638_v51, %v1573_v18  ;;  %1645 = vst.msk [vmem:[%s3947_s5 + $0xb8] sm:$0xff] %vm85_vm0, %v1613_v0  ;;  %v788_v1 = vadd.f32 1e-05, %v756_v8  ;;  %v1575_v36 = vmul.f32 %v2079_v54, %v4195_v29  ;;  %v4207_v52 = vsub.f32 %v4205_v24, %v4206_v16 }
 0x19e   :  { %2088 = vrsqrt.f32 %v789_v56  ;;  %v1615_v49 = vadd.f32 %v3638_v51, %v1576_v40  ;;  %v4210_v38 = vsub.f32 %v4208_v45, %v4209_v46  ;;  %v4213_v63 = vsub.f32 %v4211_v61, %v4212_v37 }
 0x19f   :  { %1644 = vst.msk [vmem:[%s3947_s5 + $0xb0] sm:$0xff] %vm85_vm0, %v1612_v20  ;;  %2090 = vrsqrt.f32 %v788_v1  ;;  %v2081_v35 = vpop.eup %2080  ;;  %v1614_v3 = vadd.f32 %v3638_v51, %v1575_v36 }
 0x1a0   :  { %v2083_v4 = vpop.eup %2082  ;;  %1647 = vst.msk [vmem:[%s3947_s5 + $0xc8] sm:$0xff] %vm85_vm0, %v1615_v49  ;;  %v1578_v5 = vmul.f32 %v2081_v35, %v4198_v31 }
 0x1a1   :  { %1646 = vst.msk [vmem:[%s3947_s5 + $0xc0] sm:$0xff] %vm85_vm0, %v1614_v3  ;;  %v1577_v43 = vmul.f32 %v2083_v4, %v4201_v27 }
 0x1a2   :  { %v1617_v22 = vadd.f32 %v3638_v51, %v1578_v5 }
 0x1a3   :  { %v1616_v57 = vadd.f32 %v3638_v51, %v1577_v43 }
 0x1a4   :  { %v2085_v19 = vpop.eup %2084  ;;  %1649 = vst.msk [vmem:[%s3947_s5 + $0xd8] sm:$0xff] %vm85_vm0, %v1617_v22 }
 0x1a5   :  { %v2087_v26 = vpop.eup %2086  ;;  %v1580_v7 = vmul.f32 %v2085_v19, %v4204_v42  ;;  %1648 = vst.msk [vmem:[%s3947_s5 + $0xd0] sm:$0xff] %vm85_vm0, %v1616_v57 }
 0x1a6   :  { %v1579_v6 = vmul.f32 %v2087_v26, %v4207_v52 }
 0x1a7   :  { %v1619_v9 = vadd.f32 %v3638_v51, %v1580_v7 }
 0x1a8   :  { %v2089_v34 = vpop.eup %2088  ;;  %v1618_v15 = vadd.f32 %v3638_v51, %v1579_v6 }
 0x1a9   :  { %v2091_v12 = vpop.eup %2090  ;;  %1651 = vst.msk [vmem:[%s3947_s5 + $0xe8] sm:$0xff] %vm85_vm0, %v1619_v9  ;;  %v1582_v47 = vmul.f32 %v2089_v34, %v4210_v38 }
 0x1aa   :  { %1650 = vst.msk [vmem:[%s3947_s5 + $0xe0] sm:$0xff] %vm85_vm0, %v1618_v15  ;;  %v1581_v11 = vmul.f32 %v2091_v12, %v4213_v63 }
 0x1ab   :  { %v1621_v30 = vadd.f32 %v3638_v51, %v1582_v47 }
 0x1ac   :  { %v1620_v13 = vadd.f32 %v3638_v51, %v1581_v11 }
 0x1ad   :  { %1653 = vst.msk [vmem:[%s3947_s5 + $0xf8] sm:$0xff] %vm85_vm0, %v1621_v30 }
 0x1ae   :  { %1652 = vst.msk [vmem:[%s3947_s5 + $0xf0] sm:$0xff] %vm85_vm0, %v1620_v13 }

</bundles_post_ra>
